<compile_context>
chip_gen: v7x
topology: tpu7x:2x2x1
jax: 0.10.0
libtpu: 0.0.40
codegen_flags: <defaults>
</compile_context>

<pallas_src>
import jax
import jax.numpy as jnp
from jax import lax
from jax.experimental import pallas as pl
from jax.experimental.pallas import tpu as pltpu

# ----------------------------- problem sizes --------------------------------
B = 2            # number of graphs in the demo batch (must be even: graphs are paired)
N = 64           # nodes per graph
PAIR = 2 * N     # 128 stacked nodes per grid step (full sublane/lane width)
IN_DIM = 3       # raw input feature dim (in_dim=3)
IN_PAD = 8       # zero-padded K dim for the first matmul (math-identical)
H1 = 16          # h_dims[0]
H2 = 16          # h_dims[1]
NC = 3 * 75      # n_classes = 225
NC_PAD = 256     # lane-dense padded output width
SLAB_ROWS = 64   # packed-parameter slab rows (multiple of 8)
NEG_SLOPE = 0.2  # GATConv default leaky-relu negative slope
MASK_VAL = -1e30

# packed-parameter slab row offsets (all 8-row aligned)
_W1_ROW, _W2_ROW, _B1_ROW, _B2_ROW, _WL_ROW, _BL_ROW = 0, 8, 24, 32, 40, 56


def _gat_layer(x, bias, w_aug, b, h_dim):
    """One GATConv layer (num_heads=1) on the dense block-diag pair, ReLU act."""
    # Single MXU matmul gives [fc(x), fc(x)@attn_l.T, fc(x)@attn_r.T]
    feat_aug = jnp.dot(x, w_aug, preferred_element_type=jnp.float32)   # (PAIR, h+2)
    feat = feat_aug[:, :h_dim]                  # (PAIR, h)
    el = feat_aug[:, h_dim:h_dim + 1]           # source term (PAIR, 1)
    er = feat_aug[:, h_dim + 1:h_dim + 2]       # dest term   (PAIR, 1)
    # e[v, u] = LeakyReLU(el[u] + er[v]) for edge u -> v
    e = er + el.T                               # (PAIR, PAIR)
    e = jnp.maximum(e, NEG_SLOPE * e)           # leaky relu (slope in (0,1))
    e = e + bias                                # additive mask: 0 on edges, -1e30 else
    # masked softmax over incoming edges; self-loops guarantee rowmax comes from a real
    # edge, so exp() on masked entries underflows to exactly 0 and denom >= 1.
    e = e - jnp.max(e, axis=-1, keepdims=True)
    p = jnp.exp(e)
    denom = jnp.sum(p, axis=-1, keepdims=True)
    r = pl.reciprocal(denom, approx=True)       # EUP vrcp
    r = r * (2.0 - denom * r)                   # one Newton step for accuracy
    # normalize AFTER the aggregation matmul (scale (PAIR,h), not (PAIR,PAIR))
    out = jnp.dot(p, feat, preferred_element_type=jnp.float32) * r + b
    return jnp.maximum(out, 0.0)                # ReLU activation


def _gat_kernel(x_ref, bias_ref, p_ref, out_ref):
    x = x_ref[...]                              # (PAIR, IN_PAD)
    bp = bias_ref[0]                            # (N, 2N): [graph0 bias | graph1 bias]

    # Build the (PAIR, PAIR) block-diagonal additive bias once (reused by both layers):
    # rows/cols 0..63 -> graph 0, 64..127 -> graph 1; cross-graph entries get -1e30.
    row = lax.broadcasted_iota(jnp.int32, (PAIR, PAIR), 0)
    col = lax.broadcasted_iota(jnp.int32, (PAIR, PAIR), 1)
    same = (row < N) == (col < N)
    tiled = jnp.concatenate([bp, bp], axis=0)   # (PAIR, PAIR), sublane concat only
    bias = jnp.where(same, tiled, MASK_VAL)

    # unpack the single parameter slab (row-block starts are 8-aligned)
    w1_aug = p_ref[_W1_ROW:_W1_ROW + IN_PAD, :][:, :H1 + 2]   # (8, 18)
    w2_aug = p_ref[_W2_ROW:_W2_ROW + H1, :][:, :H2 + 2]       # (16, 18)
    b1 = p_ref[_B1_ROW:_B1_ROW + 1, :][:, :H1]                # (1, 16)
    b2 = p_ref[_B2_ROW:_B2_ROW + 1, :][:, :H2]                # (1, 16)
    wl = p_ref[_WL_ROW:_WL_ROW + H2, :]                       # (16, NC_PAD)
    bl = p_ref[_BL_ROW:_BL_ROW + 1, :]                        # (1, NC_PAD)

    h = _gat_layer(x, bias, w1_aug, b1, H1)
    h = _gat_layer(h, bias, w2_aug, b2, H2)

    # dgl.max_nodes: per-graph max over that graph's nodes -> (2, H2)
    hg = jnp.concatenate(
        [jnp.max(h[:N, :], axis=0, keepdims=True),
         jnp.max(h[N:, :], axis=0, keepdims=True)], axis=0)

    # Linear head (W pre-transposed + lane-padded to 256): (2, NC_PAD)
    out_ref[0] = jnp.dot(hg, wl, preferred_element_type=jnp.float32) + bl


def _pack_params(params):
    """Pack all small params into one (SLAB_ROWS, NC_PAD) f32 slab.

    Call ONCE per set of weights (they are static across forward calls)."""
    (w1, al1, ar1, b1, w2, al2, ar2, b2, wl, bl) = params
    # augmented fc weights: [W, W@attn_l.T, W@attn_r.T]
    w1_aug = jnp.concatenate([w1, w1 @ al1.T, w1 @ ar1.T], axis=1)   # (IN_DIM, H1+2)
    w2_aug = jnp.concatenate([w2, w2 @ al2.T, w2 @ ar2.T], axis=1)   # (H1, H2+2)
    slab = jnp.zeros((SLAB_ROWS, NC_PAD), jnp.float32)
    slab = slab.at[_W1_ROW:_W1_ROW + IN_DIM, :H1 + 2].set(w1_aug)
    slab = slab.at[_W2_ROW:_W2_ROW + H1, :H2 + 2].set(w2_aug)
    slab = slab.at[_B1_ROW, :H1].set(b1[0])
    slab = slab.at[_B2_ROW, :H2].set(b2[0])
    slab = slab.at[_WL_ROW:_WL_ROW + H2, :NC].set(wl)
    slab = slab.at[_BL_ROW, :NC].set(bl[0])
    return slab


@jax.jit
def gat_forward(x, adj, slab):
    """x: (B, N, IN_DIM) f32, adj: (B, N, N) f32 (adj[b, v, u] = 1 iff edge u -> v).

    B must be even (graphs are processed in pairs of 128 stacked nodes).
    Precondition: every node has at least one in-edge (e.g. a self-loop)."""
    bq, nq, _ = x.shape
    assert bq % 2 == 0 and nq == N
    n_pairs = bq // 2

    # stacked node features, feature dim padded 3 -> 8 with zeros (math-identical)
    x_stack = jnp.pad(x.reshape(bq * nq, IN_DIM), ((0, 0), (0, IN_PAD - IN_DIM)))

    # per-graph additive attention bias (0 on edges, -1e30 elsewhere); per pair we lay
    # the two graphs side-by-side in lanes -> only (N, 2N)=32 KiB DMA'd per grid step.
    bias = jnp.where(adj > 0, 0.0, MASK_VAL).astype(jnp.float32)
    bias = bias.reshape(n_pairs, 2, nq, nq)
    bias_pair = jnp.concatenate([bias[:, 0], bias[:, 1]], axis=-1)   # (n_pairs, N, 2N)

    out = pl.pallas_call(
        _gat_kernel,
        out_shape=jax.ShapeDtypeStruct((n_pairs, 2, NC_PAD), jnp.float32),
        grid_spec=pltpu.PrefetchScalarGridSpec(
            num_scalar_prefetch=0,
            grid=(n_pairs,),
            in_specs=[
                pl.BlockSpec((PAIR, IN_PAD), lambda i: (i, 0)),          # stacked x
                pl.BlockSpec((1, N, 2 * N), lambda i: (i, 0, 0)),        # pair bias
                pl.BlockSpec((SLAB_ROWS, NC_PAD), lambda i: (0, 0)),     # packed params
            ],
            out_specs=pl.BlockSpec((1, 2, NC_PAD), lambda i: (i, 0, 0)),
        ),
        compiler_params=pltpu.CompilerParams(dimension_semantics=("parallel",)),
    )(x_stack, bias_pair, slab)
    return out.reshape(bq, NC_PAD)[:, :NC]


def gat_reference(x, adj, params):
    """Pure-JAX reference of the same forward pass (for validation)."""
    (w1, al1, ar1, b1, w2, al2, ar2, b2, wl, bl) = params

    def layer(h, a, w, al, ar, bias):
        feat = h @ w
        el = jnp.sum(feat * al, axis=-1, keepdims=True)
        er = jnp.sum(feat * ar, axis=-1, keepdims=True)
        e = er + jnp.swapaxes(el, -1, -2)
        e = jnp.where(e > 0, e, NEG_SLOPE * e)
        e = jnp.where(a > 0, e, -1e30)
        e = e - jnp.max(e, axis=-1, keepdims=True)
        p = jnp.where(a > 0, jnp.exp(e), 0.0)
        alpha = p / jnp.maximum(jnp.sum(p, axis=-1, keepdims=True), 1e-30)
        return jnp.maximum(alpha @ feat + bias, 0.0)

    h = layer(x, adj, w1, al1, ar1, b1)
    h = layer(h, adj, w2, al2, ar2, b2)
    hg = jnp.max(h, axis=1)           # (B, H2)
    return hg @ wl + bl               # (B, NC)


def init_params(key):
    ks = jax.random.split(key, 10)
    scale = lambda fan_in: 1.0 / jnp.sqrt(jnp.float32(fan_in))
    w1 = jax.random.normal(ks[0], (IN_DIM, H1), jnp.float32) * scale(IN_DIM)
    al1 = jax.random.normal(ks[1], (1, H1), jnp.float32) * scale(H1)
    ar1 = jax.random.normal(ks[2], (1, H1), jnp.float32) * scale(H1)
    b1 = jnp.zeros((1, H1), jnp.float32)
    w2 = jax.random.normal(ks[3], (H1, H2), jnp.float32) * scale(H1)
    al2 = jax.random.normal(ks[4], (1, H2), jnp.float32) * scale(H2)
    ar2 = jax.random.normal(ks[5], (1, H2), jnp.float32) * scale(H2)
    b2 = jnp.zeros((1, H2), jnp.float32)
    wl = jax.random.normal(ks[6], (H2, NC), jnp.float32) * scale(H2)   # Linear W^T
    bl = jax.random.normal(ks[7], (1, NC), jnp.float32) * 0.01
    return (w1, al1, ar1, b1, w2, al2, ar2, b2, wl, bl)


if __name__ == "__main__":
    key = jax.random.PRNGKey(0)
    kx, ka, kp = jax.random.split(key, 3)

    # node features
    x = jax.random.normal(kx, (B, N, IN_DIM), jnp.float32)
    # random sparse adjacency (dst x src) + self-loops so every node has an in-edge
    adj = (jax.random.uniform(ka, (B, N, N)) < 0.15).astype(jnp.float32)
    adj = jnp.maximum(adj, jnp.eye(N, dtype=jnp.float32)[None])

    params = init_params(kp)
    # packed once (weights are static across forward calls), reused by every call
    slab = jax.block_until_ready(_pack_params(params))

    out = jax.block_until_ready(gat_forward(x, adj, slab))
    ref = jax.block_until_ready(gat_reference(x, adj, params))

    assert out.shape == (B, NC), out.shape
    assert jnp.allclose(out, ref, atol=1e-4, rtol=1e-4), "mismatch vs JAX reference"
    print("KERNEL_OK")
</pallas_src>

<mosaic_0001>
module attributes {stable_mosaic.version = 11 : i64} {
  func.func @_gat_kernel(%arg0: i32, %arg1: memref<128x8xf32, #tpu.memory_space<vmem>>, %arg2: memref<1x64x128xf32, #tpu.memory_space<vmem>>, %arg3: memref<64x256xf32, #tpu.memory_space<vmem>>, %arg4: memref<1x2x256xf32, #tpu.memory_space<vmem>>) attributes {dimension_semantics = [#tpu.dimension_semantics<parallel>], iteration_bounds = array<i64: 1>, scalar_prefetch = 0 : i64, scratch_operands = 0 : i64, tpu.core_type = #tpu.core_type<tc>, window_params = [{transform_indices = @transform_0, window_bounds = array<i64: 128, 8>}, {transform_indices = @transform_1, window_bounds = array<i64: 1, 64, 128>}, {pipeline_mode = #tpu.pipeline_mode<synchronous>, transform_indices = @transform_2, window_bounds = array<i64: 64, 256>}, {transform_indices = @transform_3, window_bounds = array<i64: 1, 2, 256>}]} {
    %c0 = arith.constant 0 : index
    %c0_0 = arith.constant 0 : index
    %0 = vector.load %arg1[%c0, %c0_0] : memref<128x8xf32, #tpu.memory_space<vmem>>, vector<128x8xf32>
    %c0_1 = arith.constant 0 : index
    %c0_2 = arith.constant 0 : index
    %c0_3 = arith.constant 0 : index
    %1 = vector.load %arg2[%c0_1, %c0_2, %c0_3] : memref<1x64x128xf32, #tpu.memory_space<vmem>>, vector<1x64x128xf32>
    %2 = vector.shape_cast %1 : vector<1x64x128xf32> to vector<64x128xf32>
    %3 = tpu.iota {dimensions = array<i32: 0>} : vector<128x128xi32>
    %4 = tpu.iota {dimensions = array<i32: 1>} : vector<128x128xi32>
    %c64_i32 = arith.constant 64 : i32
    %5 = vector.broadcast %c64_i32 : i32 to vector<128x128xi32>
    %6 = arith.cmpi slt, %3, %5 : vector<128x128xi32>
    %c64_i32_4 = arith.constant 64 : i32
    %7 = vector.broadcast %c64_i32_4 : i32 to vector<128x128xi32>
    %8 = arith.cmpi slt, %4, %7 : vector<128x128xi32>
    %9 = arith.xori %6, %8 : vector<128x128xi1>
    %cst = arith.constant dense<true> : vector<128x128xi1>
    %10 = arith.xori %9, %cst : vector<128x128xi1>
    %11 = tpu.concatenate %2, %2 in 0 : vector<64x128xf32>, vector<64x128xf32> -> vector<128x128xf32>
    %cst_5 = arith.constant -1.000000e+30 : f32
    %12 = vector.broadcast %cst_5 : f32 to vector<128x128xf32>
    %13 = arith.select %10, %11, %12 : vector<128x128xi1>, vector<128x128xf32>
    %c0_6 = arith.constant 0 : index
    %c0_7 = arith.constant 0 : index
    %14 = vector.load %arg3[%c0_6, %c0_7] : memref<64x256xf32, #tpu.memory_space<vmem>>, vector<8x256xf32>
    %15 = vector.extract_strided_slice %14 {offsets = [0, 0], sizes = [8, 18], strides = [1, 1]} : vector<8x256xf32> to vector<8x18xf32>
    %c8 = arith.constant 8 : index
    %c0_8 = arith.constant 0 : index
    %16 = vector.load %arg3[%c8, %c0_8] : memref<64x256xf32, #tpu.memory_space<vmem>>, vector<16x256xf32>
    %17 = vector.extract_strided_slice %16 {offsets = [0, 0], sizes = [16, 18], strides = [1, 1]} : vector<16x256xf32> to vector<16x18xf32>
    %c24 = arith.constant 24 : index
    %c0_9 = arith.constant 0 : index
    %18 = vector.load %arg3[%c24, %c0_9] : memref<64x256xf32, #tpu.memory_space<vmem>>, vector<1x256xf32>
    %19 = vector.extract_strided_slice %18 {offsets = [0, 0], sizes = [1, 16], strides = [1, 1]} : vector<1x256xf32> to vector<1x16xf32>
    %c32 = arith.constant 32 : index
    %c0_10 = arith.constant 0 : index
    %20 = vector.load %arg3[%c32, %c0_10] : memref<64x256xf32, #tpu.memory_space<vmem>>, vector<1x256xf32>
    %21 = vector.extract_strided_slice %20 {offsets = [0, 0], sizes = [1, 16], strides = [1, 1]} : vector<1x256xf32> to vector<1x16xf32>
    %c40 = arith.constant 40 : index
    %c0_11 = arith.constant 0 : index
    %22 = vector.load %arg3[%c40, %c0_11] : memref<64x256xf32, #tpu.memory_space<vmem>>, vector<16x256xf32>
    %c56 = arith.constant 56 : index
    %c0_12 = arith.constant 0 : index
    %23 = vector.load %arg3[%c56, %c0_12] : memref<64x256xf32, #tpu.memory_space<vmem>>, vector<1x256xf32>
    %cst_13 = arith.constant dense<0.000000e+00> : vector<128x18xf32>
    %24 = tpu.matmul %0, %15, %cst_13 {dimension_numbers = #tpu.dot_dimension_numbers<[1], [0], [0], [1], [0, 0, 1, 1], [], []>} : vector<128x8xf32>, vector<8x18xf32>, vector<128x18xf32> -> vector<128x18xf32>
    %25 = vector.extract_strided_slice %24 {offsets = [0, 0], sizes = [128, 16], strides = [1, 1]} : vector<128x18xf32> to vector<128x16xf32>
    %26 = vector.extract_strided_slice %24 {offsets = [0, 16], sizes = [128, 1], strides = [1, 1]} : vector<128x18xf32> to vector<128x1xf32>
    %27 = vector.extract_strided_slice %24 {offsets = [0, 17], sizes = [128, 1], strides = [1, 1]} : vector<128x18xf32> to vector<128x1xf32>
    %28 = tpu.transpose %26, [1, 0] : vector<128x1xf32> -> vector<1x128xf32>
    %29 = vector.broadcast %27 : vector<128x1xf32> to vector<128x128xf32>
    %30 = vector.broadcast %28 : vector<1x128xf32> to vector<128x128xf32>
    %31 = arith.addf %29, %30 : vector<128x128xf32>
    %cst_14 = arith.constant 2.000000e-01 : f32
    %32 = vector.broadcast %cst_14 : f32 to vector<128x128xf32>
    %33 = arith.mulf %32, %31 : vector<128x128xf32>
    %34 = arith.maximumf %31, %33 : vector<128x128xf32>
    %35 = arith.addf %34, %13 : vector<128x128xf32>
    %cst_15 = arith.constant dense<0xFF800000> : vector<128xf32>
    %36 = vector.multi_reduction <maximumf>, %35, %cst_15 [1] : vector<128x128xf32> to vector<128xf32>
    %37 = vector.shape_cast %36 : vector<128xf32> to vector<128x1xf32>
    %38 = vector.broadcast %37 : vector<128x1xf32> to vector<128x128xf32>
    %39 = arith.subf %35, %38 : vector<128x128xf32>
    %40 = math.exp %39 : vector<128x128xf32>
    %cst_16 = arith.constant dense<0.000000e+00> : vector<128xf32>
    %41 = vector.multi_reduction <add>, %40, %cst_16 [1] : vector<128x128xf32> to vector<128xf32>
    %42 = vector.shape_cast %41 : vector<128xf32> to vector<128x1xf32>
    %43 = tpu.reciprocal %42 {approx = true} : vector<128x1xf32> -> vector<128x1xf32>
    %44 = arith.mulf %42, %43 : vector<128x1xf32>
    %cst_17 = arith.constant 2.000000e+00 : f32
    %45 = vector.broadcast %cst_17 : f32 to vector<128x1xf32>
    %46 = arith.subf %45, %44 : vector<128x1xf32>
    %47 = arith.mulf %43, %46 : vector<128x1xf32>
    %cst_18 = arith.constant dense<0.000000e+00> : vector<128x16xf32>
    %48 = tpu.matmul %40, %25, %cst_18 {dimension_numbers = #tpu.dot_dimension_numbers<[1], [0], [0], [1], [0, 0, 1, 1], [], []>} : vector<128x128xf32>, vector<128x16xf32>, vector<128x16xf32> -> vector<128x16xf32>
    %49 = vector.broadcast %47 : vector<128x1xf32> to vector<128x16xf32>
    %50 = arith.mulf %48, %49 : vector<128x16xf32>
    %51 = vector.broadcast %19 : vector<1x16xf32> to vector<128x16xf32>
    %52 = arith.addf %50, %51 : vector<128x16xf32>
    %cst_19 = arith.constant 0.000000e+00 : f32
    %53 = vector.broadcast %cst_19 : f32 to vector<128x16xf32>
    %54 = arith.maximumf %52, %53 : vector<128x16xf32>
    %cst_20 = arith.constant dense<0.000000e+00> : vector<128x18xf32>
    %55 = tpu.matmul %54, %17, %cst_20 {dimension_numbers = #tpu.dot_dimension_numbers<[1], [0], [0], [1], [0, 0, 1, 1], [], []>} : vector<128x16xf32>, vector<16x18xf32>, vector<128x18xf32> -> vector<128x18xf32>
    %56 = vector.extract_strided_slice %55 {offsets = [0, 0], sizes = [128, 16], strides = [1, 1]} : vector<128x18xf32> to vector<128x16xf32>
    %57 = vector.extract_strided_slice %55 {offsets = [0, 16], sizes = [128, 1], strides = [1, 1]} : vector<128x18xf32> to vector<128x1xf32>
    %58 = vector.extract_strided_slice %55 {offsets = [0, 17], sizes = [128, 1], strides = [1, 1]} : vector<128x18xf32> to vector<128x1xf32>
    %59 = tpu.transpose %57, [1, 0] : vector<128x1xf32> -> vector<1x128xf32>
    %60 = vector.broadcast %58 : vector<128x1xf32> to vector<128x128xf32>
    %61 = vector.broadcast %59 : vector<1x128xf32> to vector<128x128xf32>
    %62 = arith.addf %60, %61 : vector<128x128xf32>
    %cst_21 = arith.constant 2.000000e-01 : f32
    %63 = vector.broadcast %cst_21 : f32 to vector<128x128xf32>
    %64 = arith.mulf %63, %62 : vector<128x128xf32>
    %65 = arith.maximumf %62, %64 : vector<128x128xf32>
    %66 = arith.addf %65, %13 : vector<128x128xf32>
    %cst_22 = arith.constant dense<0xFF800000> : vector<128xf32>
    %67 = vector.multi_reduction <maximumf>, %66, %cst_22 [1] : vector<128x128xf32> to vector<128xf32>
    %68 = vector.shape_cast %67 : vector<128xf32> to vector<128x1xf32>
    %69 = vector.broadcast %68 : vector<128x1xf32> to vector<128x128xf32>
    %70 = arith.subf %66, %69 : vector<128x128xf32>
    %71 = math.exp %70 : vector<128x128xf32>
    %cst_23 = arith.constant dense<0.000000e+00> : vector<128xf32>
    %72 = vector.multi_reduction <add>, %71, %cst_23 [1] : vector<128x128xf32> to vector<128xf32>
    %73 = vector.shape_cast %72 : vector<128xf32> to vector<128x1xf32>
    %74 = tpu.reciprocal %73 {approx = true} : vector<128x1xf32> -> vector<128x1xf32>
    %75 = arith.mulf %73, %74 : vector<128x1xf32>
    %cst_24 = arith.constant 2.000000e+00 : f32
    %76 = vector.broadcast %cst_24 : f32 to vector<128x1xf32>
    %77 = arith.subf %76, %75 : vector<128x1xf32>
    %78 = arith.mulf %74, %77 : vector<128x1xf32>
    %cst_25 = arith.constant dense<0.000000e+00> : vector<128x16xf32>
    %79 = tpu.matmul %71, %56, %cst_25 {dimension_numbers = #tpu.dot_dimension_numbers<[1], [0], [0], [1], [0, 0, 1, 1], [], []>} : vector<128x128xf32>, vector<128x16xf32>, vector<128x16xf32> -> vector<128x16xf32>
    %80 = vector.broadcast %78 : vector<128x1xf32> to vector<128x16xf32>
    %81 = arith.mulf %79, %80 : vector<128x16xf32>
    %82 = vector.broadcast %21 : vector<1x16xf32> to vector<128x16xf32>
    %83 = arith.addf %81, %82 : vector<128x16xf32>
    %cst_26 = arith.constant 0.000000e+00 : f32
    %84 = vector.broadcast %cst_26 : f32 to vector<128x16xf32>
    %85 = arith.maximumf %83, %84 : vector<128x16xf32>
    %86 = vector.extract_strided_slice %85 {offsets = [0, 0], sizes = [64, 16], strides = [1, 1]} : vector<128x16xf32> to vector<64x16xf32>
    %cst_27 = arith.constant dense<0xFF800000> : vector<16xf32>
    %87 = vector.multi_reduction <maximumf>, %86, %cst_27 [0] : vector<64x16xf32> to vector<16xf32>
    %88 = vector.shape_cast %87 : vector<16xf32> to vector<1x16xf32>
    %89 = vector.extract_strided_slice %85 {offsets = [64, 0], sizes = [64, 16], strides = [1, 1]} : vector<128x16xf32> to vector<64x16xf32>
    %cst_28 = arith.constant dense<0xFF800000> : vector<16xf32>
    %90 = vector.multi_reduction <maximumf>, %89, %cst_28 [0] : vector<64x16xf32> to vector<16xf32>
    %91 = vector.shape_cast %90 : vector<16xf32> to vector<1x16xf32>
    %92 = tpu.concatenate %88, %91 in 0 : vector<1x16xf32>, vector<1x16xf32> -> vector<2x16xf32>
    %cst_29 = arith.constant dense<0.000000e+00> : vector<2x256xf32>
    %93 = tpu.matmul %92, %22, %cst_29 {dimension_numbers = #tpu.dot_dimension_numbers<[1], [0], [0], [1], [0, 0, 1, 1], [], []>} : vector<2x16xf32>, vector<16x256xf32>, vector<2x256xf32> -> vector<2x256xf32>
    %94 = vector.broadcast %23 : vector<1x256xf32> to vector<2x256xf32>
    %95 = arith.addf %93, %94 : vector<2x256xf32>
    %c0_30 = arith.constant 0 : index
    %c0_31 = arith.constant 0 : index
    %c0_32 = arith.constant 0 : index
    %96 = vector.load %arg4[%c0_30, %c0_31, %c0_32] : memref<1x2x256xf32, #tpu.memory_space<vmem>>, vector<1x2x256xf32>
    %97 = vector.shape_cast %96 : vector<1x2x256xf32> to vector<2x256xf32>
    %98 = vector.shape_cast %95 : vector<2x256xf32> to vector<1x2x256xf32>
    tpu.vector_store %arg4[%c0_30, %c0_31, %c0_32], %98 {strides = array<i32>} : memref<1x2x256xf32, #tpu.memory_space<vmem>>, vector<1x2x256xf32>,
    return
  }
  func.func @transform_0(%arg0: i32) -> (i32, i32) {
    %c0_i32 = arith.constant 0 : i32
    %c0_i32_0 = arith.constant 0 : i32
    return %arg0, %c0_i32 : i32, i32
  }
  func.func @transform_1(%arg0: i32) -> (i32, i32, i32) {
    %c0_i32 = arith.constant 0 : i32
    %c0_i32_0 = arith.constant 0 : i32
    %c0_i32_1 = arith.constant 0 : i32
    return %arg0, %c0_i32, %c0_i32_0 : i32, i32, i32
  }
  func.func @transform_2(%arg0: i32) -> (i32, i32) {
    %c0_i32 = arith.constant 0 : i32
    %c0_i32_0 = arith.constant 0 : i32
    %c0_i32_1 = arith.constant 0 : i32
    return %c0_i32, %c0_i32_0 : i32, i32
  }
  func.func @transform_3(%arg0: i32) -> (i32, i32, i32) {
    %c0_i32 = arith.constant 0 : i32
    %c0_i32_0 = arith.constant 0 : i32
    %c0_i32_1 = arith.constant 0 : i32
    return %arg0, %c0_i32, %c0_i32_0 : i32, i32, i32
  }
}

</mosaic_0001>

<bundles_post_ra>
// kernel: gat_forward.1
= control target key start
LH: loop header
LB: loop body
LE: loop exit
PB: predicated region body
PF: predicated region fallthrough
CT: control target
= control target key end

     0   :  { %vm136_vm0 = vcmask 64512   ;;  %s3078_s0 = inlined_call_operand.vmem [shape: f32[128,8], index: 0, kind: input, shape index: {}]   ;;  %s3079_s1 = inlined_call_operand.vmem [shape: f32[1,64,128], index: 1, kind: input, shape index: {}]   ;;  %s3080_s2 = inlined_call_operand.vmem [shape: f32[64,256], index: 2, kind: input, shape index: {}]   ;;  %s3081_s3 = inlined_call_operand.hbm [shape: f32[1,2,256], index: 3, kind: output, shape index: {}]  }
   0x1   :  { %v123_v0 = vld [vmem:[%s3080_s2] sm:$0xff]  ;;  %v16_v2 = vld [vmem:[%s3078_s0 + $0x8] sm:$0xff]  ;;  %v17_v3 = vld [vmem:[%s3078_s0 + $0x10] sm:$0xff] }
   0x2   :  { %v15_v1 = vld [vmem:[%s3078_s0] sm:$0xff]  ;;  %2021 = vmatprep.subr.mxu0 %v123_v0  ;;  %v18_v4 = vld [vmem:[%s3078_s0 + $0x18] sm:$0xff] }
   0x3   :  { %2023 = vmatprep.mubr.msk.f32.mxu0 %vm136_vm0, %v15_v1  ;;  %2022 = vmatpush3.msra.mxu0 %v123_v0  ;;  %v19_v5 = vld [vmem:[%s3078_s0 + $0x20] sm:$0xff] }
   0x4   :  { %2024 = vmatmul.mubr.msk.f32.vlgmr.msra.gmra.mrb[0].mxu0 %vm136_vm0, %v16_v2 }
   0x5   :  { %2026 = vmatprep.mubr.msk.f32.mxu0 %vm136_vm0, %v17_v3 }
   0x6   :  { %8 = vsyncpa [#allocation3], 0  ;;  %v20_v6 = vld [vmem:[%s3078_s0 + $0x28] sm:$0xff]  ;;  %v21_v7 = vld [vmem:[%s3078_s0 + $0x30] sm:$0xff]  ;;  %v2434_v17 = vmov 17   ;;  %s2435_s19 = smov 112   ;;  %v56_v63 = vlaneseq }
   0x7   :  { %v22_v8 = vld [vmem:[%s3078_s0 + $0x38] sm:$0xff]  ;;  %v23_v9 = vld [vmem:[%s3078_s0 + $0x40] sm:$0xff]  ;;  %v24_v10 = vld [vmem:[%s3078_s0 + $0x48] sm:$0xff]  ;;  %2280 = vset.pattern.permute.xlu0 %v2434_v17  ;;  %2281 = vset.pattern.permute.xlu1 %v2434_v17  ;;  %vm2436_vm2 = vmmov 1   ;;  %vm933_vm6 = vcmask 130048   ;;  %vm1772_vm7 = vcmask 1040384  }
   0x8   :  { %2027 = vmatmul.mubr.msk.f32.gmra.mrb[2].mxu0 %vm136_vm0, %v18_v4  ;;  %v25_v11 = vld [vmem:[%s3078_s0 + $0x50] sm:$0xff]  ;;  %v26_v12 = vld [vmem:[%s3078_s0 + $0x58] sm:$0xff]  ;;  %v27_v13 = vld [vmem:[%s3078_s0 + $0x60] sm:$0xff]  ;;  %v2546_v1 = vand.u32 127, %v56_v63  ;;  %v2548_v2 = vshrl.u32 %v56_v63, 7  ;;  %s2438_s24 = smov [#allocation2]  }
   0x9   :  { %2029 = vmatprep.mubr.msk.f32.mxu0 %vm136_vm0, %v19_v5  ;;  %v28_v14 = vld [vmem:[%s3078_s0 + $0x68] sm:$0xff]  ;;  %v29_v15 = vld [vmem:[%s3078_s0 + $0x70] sm:$0xff]  ;;  %v30_v16 = vld [vmem:[%s3078_s0 + $0x78] sm:$0xff]  ;;  %s1877_s25 = sshll.u32 %s2438_s24, 4  ;;  %s1878_s25 = int_to_ptr.vmem [resolvable:$true] %s1877_s25 }
   0xa   :  { %vm74_vm1 = vcmp.lt.s32.totalorder %v2546_v1, 64  ;;  %v2554_v4 = vsub.s32 0, %v2548_v2  ;;  %v2583_v17 = vld [vmem:[%s3079_s1 + $0x8] sm:$0xff]  ;;  %s2410_s26 = scalar_lea.vmem %s1878_s25, 64  ;;  %p2415_p1 = scmp.lt.s32.totalorder %s1878_s25, %s1878_s25 }
   0xb   :  { %vm75_vm3 = vmxor %vm2436_vm2, %vm74_vm1  ;;  %p2411_p0 = scmp.ne.s32.totalorder %s1878_s25, %s2410_s26  ;;  %p2416_p2 = scmp.lt.s32.totalorder %s2410_s26, %s2410_s26 }
   0xc   :  { %2030 = vmatmul.mubr.msk.f32.gmra.mrb[4].mxu0 %vm136_vm0, %v20_v6  ;;  %vm2568_vm4 = vmxor %vm75_vm3, %vm2436_vm2 }
   0xd   :  { %2032 = vmatprep.mubr.msk.f32.mxu0 %vm136_vm0, %v21_v7  ;;  %vm2677_vm5 = vmxor %vm74_vm1, %vm2436_vm2  ;;  %p2417_p3 = por %p2416_p2, %p2415_p1 }
   0xf   :  { %p2418_p4 = pnand %p2417_p3, %p2411_p0 }
  0x10   :  { %2033 = vmatmul.mubr.msk.f32.gmra.mrb[6].mxu0 %vm136_vm0, %v22_v8  ;;  %v2565_v8 = vld [vmem:[%s3079_s1] sm:$0xff] }
  0x11   :  { %2035 = vmatprep.mubr.msk.f32.mxu0 %vm136_vm0, %v23_v9 }
  0x14   :  { %2036 = vmatmul.mubr.msk.f32.gmra.mrb[8].mxu0 %vm136_vm0, %v24_v10 }
  0x15   :  { %2038 = vmatprep.mubr.msk.f32.mxu0 %vm136_vm0, %v25_v11 }
  0x18   :  { %2039 = vmatmul.mubr.msk.f32.gmra.mrb[10].mxu0 %vm136_vm0, %v26_v12 }
  0x19   :  { %2041 = vmatprep.mubr.msk.f32.mxu0 %vm136_vm0, %v27_v13 }
  0x1c   :  { %2042 = vmatmul.mubr.msk.f32.gmra.mrb[12].mxu0 %vm136_vm0, %v28_v14 }
  0x1d   :  { %2044 = vmatprep.mubr.msk.f32.mxu0 %vm136_vm0, %v29_v15  ;;  %v2578_v15 = vsel %vm2568_vm4, %v2565_v8, -1e+30 }
  0x20   :  { %2045 = vmatmul.mubr.msk.f32.gmra.mrb[14].mxu0 %vm136_vm0, %v30_v16 }
  0xd7   :  { %v2025_v18 = vpop.f32.mrb[0].mxu0 }
  0xd8   :  { %v251_v19 = vpop.f32.mrb[1].mxu0 }
  0xd9   :  { %346 = vrot.lane.b32.xlu0 %v251_v19, %s2435_s19  ;;  %v2187_v20 = vpack.c.bf16 %v2025_v18, %v251_v19 }
  0xdb   :  { %v2028_v21 = vpop.f32.mrb[2].mxu0  ;;  %2188 = vmatprep.subr.bf16.mxu1 %v2187_v20 }
  0xdc   :  { %2190 = vmatpush3.bf16.msra.mxu1 %v2187_v20  ;;  %352 = vrot.lane.b32.xlu1 %v2028_v21, %s2435_s19  ;;  %v261_v22 = vpop.f32.mrb[3].mxu0 }
  0xdd   :  { %v2191_v23 = vpack.c.bf16 %v2028_v21, %v261_v22  ;;  %348 = vrot.lane.b32.xlu0 %v2025_v18, %s2435_s19 }
  0xdf   :  { %v2031_v24 = vpop.f32.mrb[4].mxu0  ;;  %2192 = vmatprep.subr.bf16.mxu1 %v2191_v23 }
  0xe0   :  { %350 = vrot.lane.b32.xlu1 %v261_v22, %s2435_s19  ;;  %v271_v25 = vpop.f32.mrb[5].mxu0  ;;  %2194 = vmatpush3.bf16.msra.mxu1 %v2191_v23  ;;  %v2592_v23 = vsel %vm2568_vm4, %v2583_v17, -1e+30 }
  0xe1   :  { %v2195_v26 = vpack.c.bf16 %v2031_v24, %v271_v25  ;;  %354 = vrot.lane.b32.xlu0 %v271_v25, %s2435_s19 }
  0xe3   :  { %v2034_v27 = vpop.f32.mrb[6].mxu0  ;;  %2196 = vmatprep.subr.bf16.mxu1 %v2195_v26 }
  0xe4   :  { %356 = vrot.lane.b32.xlu1 %v2031_v24, %s2435_s19  ;;  %v281_v28 = vpop.f32.mrb[7].mxu0  ;;  %2198 = vmatpush3.bf16.msra.mxu1 %v2195_v26 }
  0xe5   :  { %v2199_v29 = vpack.c.bf16 %v2034_v27, %v281_v28  ;;  %358 = vrot.lane.b32.xlu0 %v281_v28, %s2435_s19 }
  0xe7   :  { %v2037_v30 = vpop.f32.mrb[8].mxu0  ;;  %2200 = vmatprep.subr.bf16.mxu1 %v2199_v29 }
  0xe8   :  { %360 = vrot.lane.b32.xlu1 %v2034_v27, %s2435_s19  ;;  %v291_v31 = vpop.f32.mrb[9].mxu0  ;;  %2202 = vmatpush3.bf16.msra.mxu1 %v2199_v29 }
  0xe9   :  { %v2203_v32 = vpack.c.bf16 %v2037_v30, %v291_v31  ;;  %362 = vrot.lane.b32.xlu0 %v291_v31, %s2435_s19 }
  0xeb   :  { %v2040_v33 = vpop.f32.mrb[10].mxu0  ;;  %2204 = vmatprep.subr.bf16.mxu1 %v2203_v32 }
  0xec   :  { %364 = vrot.lane.b32.xlu1 %v2037_v30, %s2435_s19  ;;  %v301_v34 = vpop.f32.mrb[11].mxu0  ;;  %2206 = vmatpush3.bf16.msra.mxu1 %v2203_v32 }
  0xed   :  { %v2207_v35 = vpack.c.bf16 %v2040_v33, %v301_v34  ;;  %366 = vrot.lane.b32.xlu0 %v301_v34, %s2435_s19 }
  0xef   :  { %v2043_v36 = vpop.f32.mrb[12].mxu0  ;;  %2208 = vmatprep.subr.bf16.mxu1 %v2207_v35 }
  0xf0   :  { %368 = vrot.lane.b32.xlu1 %v2040_v33, %s2435_s19  ;;  %v311_v37 = vpop.f32.mrb[13].mxu0  ;;  %2210 = vmatpush3.bf16.msra.mxu1 %v2207_v35 }
  0xf1   :  { %v2211_v38 = vpack.c.bf16 %v2043_v36, %v311_v37  ;;  %370 = vrot.lane.b32.xlu0 %v311_v37, %s2435_s19 }
  0xf3   :  { %v2046_v39 = vpop.f32.mrb[14].mxu0  ;;  %2212 = vmatprep.subr.bf16.mxu1 %v2211_v38 }
  0xf4   :  { %372 = vrot.lane.b32.xlu1 %v2043_v36, %s2435_s19  ;;  %v321_v40 = vpop.f32.mrb[15].mxu0  ;;  %2214 = vmatpush3.bf16.msra.mxu1 %v2211_v38 }
  0xf5   :  { %v2215_v41 = vpack.c.bf16 %v2046_v39, %v321_v40  ;;  %374 = vrot.lane.b32.xlu0 %v321_v40, %s2435_s19 }
  0xf7   :  { %2216 = vmatprep.subr.bf16.mxu1 %v2215_v41 }
  0xf8   :  { %376 = vrot.lane.b32.xlu1 %v2046_v39, %s2435_s19  ;;  %2218 = vmatpush3.bf16.msra.mxu1 %v2215_v41 }
  0xf9   :  { %427 = vperm.xlu0 %2280, %v251_v19  }
  0xfc   :  { %431 = vperm.xlu1 %2281, %v2025_v18  }
  0xfd   :  { %439 = vperm.xlu0 %2280, %v2028_v21  }
 0x100   :  { %435 = vperm.xlu1 %2281, %v261_v22  }
 0x101   :  { %447 = vperm.xlu0 %2280, %v2031_v24   ;;  %v2598_v24 = vld [vmem:[%s3079_s1 + $0x10] sm:$0xff] }
 0x102   :  { %v2607_v29 = vsel %vm2568_vm4, %v2598_v24, -1e+30 }
 0x104   :  { %443 = vperm.xlu1 %2281, %v271_v25  }
 0x105   :  { %455 = vperm.xlu0 %2280, %v2034_v27  }
 0x108   :  { %451 = vperm.xlu1 %2281, %v281_v28  }
 0x109   :  { %463 = vperm.xlu0 %2280, %v2037_v30   ;;  %v2613_v30 = vld [vmem:[%s3079_s1 + $0x18] sm:$0xff] }
 0x10c   :  { %459 = vperm.xlu1 %2281, %v291_v31  }
 0x10d   :  { %471 = vperm.xlu0 %2280, %v2040_v33  }
 0x110   :  { %467 = vperm.xlu1 %2281, %v301_v34  }
 0x111   :  { %479 = vperm.xlu0 %2280, %v2043_v36   ;;  %v2622_v36 = vsel %vm2568_vm4, %v2613_v30, -1e+30 }
 0x114   :  { %475 = vperm.xlu1 %2281, %v311_v37   ;;  %v35_v37 = vld [vmem:[%s3079_s1 + $0x20] sm:$0xff] }
 0x115   :  { %483 = vperm.xlu0 %2280, %v321_v40  }
 0x119   :  { %487 = vperm.xlu0 %2280, %v2046_v39  }
 0x14b   :  { %v347_v42 = vpop.permute.xlu0 %346 }
 0x14c   :  { %394 = vxpose.xlu1.b32.start [1/16] (narrow) %v347_v42, 8  ;;  %v2634_v42 = vsel %vm2568_vm4, %v35_v37, -1e+30 }
 0x14e   :  { %v353_v43 = vpop.permute.xlu1 %352 }
 0x14f   :  { %v349_v44 = vpop.permute.xlu0 %348 }
 0x150   :  { %395 = vxpose.xlu1.b32.cont [2/16] (narrow) %v349_v44, 8 }
 0x152   :  { %v351_v45 = vpop.permute.xlu1 %350 }
 0x153   :  { %v355_v46 = vpop.permute.xlu0 %354 }
 0x154   :  { %396 = vxpose.xlu1.b32.cont [3/16] (narrow) %v351_v45, 8 }
 0x156   :  { %v357_v47 = vpop.permute.xlu1 %356 }
 0x157   :  { %v359_v48 = vpop.permute.xlu0 %358 }
 0x158   :  { %397 = vxpose.xlu1.b32.cont [4/16] (narrow) %v353_v43, 8  ;;  %v36_v43 = vld [vmem:[%s3079_s1 + $0x28] sm:$0xff] }
 0x15a   :  { %v361_v49 = vpop.permute.xlu1 %360 }
 0x15b   :  { %v363_v50 = vpop.permute.xlu0 %362 }
 0x15c   :  { %398 = vxpose.xlu1.b32.cont [5/16] (narrow) %v355_v46, 8 }
 0x15e   :  { %v365_v51 = vpop.permute.xlu1 %364 }
 0x15f   :  { %v367_v52 = vpop.permute.xlu0 %366 }
 0x160   :  { %399 = vxpose.xlu1.b32.cont [6/16] (narrow) %v357_v47, 8 }
 0x162   :  { %v369_v53 = vpop.permute.xlu1 %368 }
 0x163   :  { %v371_v54 = vpop.permute.xlu0 %370 }
 0x164   :  { %400 = vxpose.xlu1.b32.cont [7/16] (narrow) %v359_v48, 8 }
 0x166   :  { %v373_v55 = vpop.permute.xlu1 %372 }
 0x167   :  { %v375_v56 = vpop.permute.xlu0 %374 }
 0x168   :  { %401 = vxpose.xlu1.b32.cont [8/16] (narrow) %v361_v49, 8  ;;  %v2646_v49 = vsel %vm2568_vm4, %v36_v43, -1e+30 }
 0x16a   :  { %v377_v57 = vpop.permute.xlu1 %376 }
 0x16c   :  { %402 = vxpose.xlu1.b32.cont [9/16] (narrow) %v363_v50, 8  ;;  %v37_v50 = vld [vmem:[%s3079_s1 + $0x30] sm:$0xff] }
 0x170   :  { %403 = vxpose.xlu1.b32.cont [10/16] (narrow) %v365_v51, 8 }
 0x174   :  { %404 = vxpose.xlu1.b32.cont [11/16] (narrow) %v367_v52, 8 }
 0x178   :  { %405 = vxpose.xlu1.b32.cont [12/16] (narrow) %v369_v53, 8  ;;  %v428_v7 = vpop.permute.xlu0 %427 }
 0x17b   :  { %v432_v58 = vpop.permute.xlu1 %431 }
 0x17c   :  { %406 = vxpose.xlu1.b32.cont [13/16] (narrow) %v371_v54, 8  ;;  %v440_v18 = vpop.permute.xlu0 %439 }
 0x17f   :  { %v436_v59 = vpop.permute.xlu1 %435 }
 0x180   :  { %407 = vxpose.xlu1.b32.cont [14/16] (narrow) %v373_v55, 8  ;;  %v448_v31 = vpop.permute.xlu0 %447  ;;  %v2659_v55 = vsel %vm2568_vm4, %v37_v50, -1e+30 }
 0x183   :  { %v444_v60 = vpop.permute.xlu1 %443 }
 0x184   :  { %408 = vxpose.xlu1.b32.cont [15/16] (narrow) %v375_v56, 8  ;;  %v456_v44 = vpop.permute.xlu0 %455  ;;  %v38_v56 = vld [vmem:[%s3079_s1 + $0x38] sm:$0xff] }
 0x187   :  { %v452_v61 = vpop.permute.xlu1 %451 }
 0x188   :  { %409 = vxpose.xlu1.b32.end [16/16] (narrow) %v377_v57, 8  ;;  %v464_v57 = vpop.permute.xlu0 %463 }
 0x18b   :  { %v2542_v62 = vpop.permute.xlu1 %459 }
 0x18c   :  { %v472_v9 = vpop.permute.xlu0 %471 }
 0x18f   :  { %v2544_v0 = vpop.permute.xlu1 %467 }
 0x193   :  { %v2550_v3 = vpop.permute.xlu1 %475 }
 0x1cc   :  { %v410_v5 = vpop.trf.xlu1 }
 0x1cd   :  { %v2560_v6 = vrot.slane %v410_v5, %v2554_v4 }
 0x1cf   :  { %v494_v10 = vadd.f32 %v2560_v6, %v428_v7  ;;  %v495_v11 = vadd.f32 %v2560_v6, %v432_v58  ;;  %v496_v14 = vadd.f32 %v2560_v6, %v436_v59  ;;  %v497_v22 = vadd.f32 %v2560_v6, %v440_v18 }
 0x1d0   :  { %v498_v28 = vadd.f32 %v2560_v6, %v444_v60  ;;  %v499_v35 = vadd.f32 %v2560_v6, %v448_v31  ;;  %v500_v41 = vadd.f32 %v2560_v6, %v452_v61  ;;  %v501_v48 = vadd.f32 %v2560_v6, %v456_v44 }
 0x1d1   :  { %v510_v12 = vmul.f32 0.2, %v494_v10  ;;  %v511_v13 = vmul.f32 0.2, %v495_v11  ;;  %v512_v21 = vmul.f32 0.2, %v496_v14  ;;  %v502_v54 = vadd.f32 %v2560_v6, %v2542_v62 }
 0x1d2   :  { %v513_v27 = vmul.f32 0.2, %v497_v22  ;;  %v514_v34 = vmul.f32 0.2, %v498_v28  ;;  %v515_v40 = vmul.f32 0.2, %v499_v35  ;;  %v503_v61 = vadd.f32 %v2560_v6, %v464_v57 }
 0x1d3   :  { %v526_v16 = vmax.f32 %v494_v10, %v510_v12  ;;  %v527_v20 = vmax.f32 %v495_v11, %v511_v13  ;;  %v528_v26 = vmax.f32 %v496_v14, %v512_v21  ;;  %v516_v47 = vmul.f32 0.2, %v500_v41 }
 0x1d4   :  { %v529_v33 = vmax.f32 %v497_v22, %v513_v27  ;;  %v530_v39 = vmax.f32 %v498_v28, %v514_v34  ;;  %v531_v46 = vmax.f32 %v499_v35, %v515_v40  ;;  %v517_v53 = vmul.f32 0.2, %v501_v48 }
 0x1d5   :  { %v2586_v19 = vadd.f32 %v526_v16, %v2578_v15  ;;  %v2601_v25 = vadd.f32 %v527_v20, %v2592_v23  ;;  %v2616_v32 = vadd.f32 %v528_v26, %v2607_v29  ;;  %v532_v52 = vmax.f32 %v500_v41, %v516_v47 }
 0x1d6   :  { %v2629_v38 = vadd.f32 %v529_v33, %v2622_v36  ;;  %v2641_v45 = vadd.f32 %v530_v39, %v2634_v42  ;;  %v2653_v51 = vadd.f32 %v531_v46, %v2646_v49  ;;  %v533_v59 = vmax.f32 %v501_v48, %v517_v53 }
 0x1d7   :  { %558 = vmax.xlane.f32.xlu0 %v2586_v19  ;;  %v2666_v58 = vadd.f32 %v532_v52, %v2659_v55  ;;  %v518_v60 = vmul.f32 0.2, %v502_v54  ;;  %v2671_v62 = vsel %vm2568_vm4, %v38_v56, -1e+30  ;;  %v519_v10 = vmul.f32 0.2, %v503_v61 }
 0x1d8   :  { %v2682_v5 = vadd.f32 %v533_v59, %v2671_v62  ;;  %v504_v11 = vadd.f32 %v2560_v6, %v2544_v0  ;;  %v2689_v12 = vsel %vm2677_vm5, %v2565_v8, -1e+30  ;;  %v505_v16 = vadd.f32 %v2560_v6, %v472_v9  ;;  %v480_v0 = vpop.permute.xlu0 %479 }
 0x1d9   :  { %v534_v7 = vmax.f32 %v502_v54, %v518_v60  ;;  %v535_v13 = vmax.f32 %v503_v61, %v519_v10  ;;  %v2699_v18 = vsel %vm2677_vm5, %v2583_v17, -1e+30  ;;  %v506_v22 = vadd.f32 %v2560_v6, %v2550_v3 }
 0x1da   :  { %v520_v14 = vmul.f32 0.2, %v504_v11  ;;  %v521_v21 = vmul.f32 0.2, %v505_v16  ;;  %v2710_v26 = vsel %vm2677_vm5, %v2598_v24, -1e+30  ;;  %v507_v31 = vadd.f32 %v2560_v6, %v480_v0 }
 0x1db   :  { %560 = vmax.xlane.f32.xlu0 %v2601_v25  ;;  %v2693_v1 = vadd.f32 %v534_v7, %v2689_v12  ;;  %v2703_v8 = vadd.f32 %v535_v13, %v2699_v18  ;;  %v522_v28 = vmul.f32 0.2, %v506_v22  ;;  %v2720_v34 = vsel %vm2677_vm5, %v2613_v30, -1e+30 }
 0x1dc   :  { %v536_v20 = vmax.f32 %v504_v11, %v520_v14  ;;  %v537_v27 = vmax.f32 %v505_v16, %v521_v21  ;;  %v484_v33 = vpop.permute.xlu0 %483  ;;  %v523_v35 = vmul.f32 0.2, %v507_v31  ;;  %v2729_v40 = vsel %vm2677_vm5, %v35_v37, -1e+30 }
 0x1dd   :  { %v538_v24 = vmax.f32 %v506_v22, %v522_v28  ;;  %v508_v39 = vadd.f32 %v2560_v6, %v484_v33  ;;  %v2738_v48 = vsel %vm2677_vm5, %v36_v43, -1e+30  ;;  %v2746_v54 = vsel %vm2677_vm5, %v37_v50, -1e+30 }
 0x1de   :  { %v2714_v17 = vadd.f32 %v536_v20, %v2710_v26  ;;  %v2724_v3 = vadd.f32 %v537_v27, %v2720_v34  ;;  %v539_v30 = vmax.f32 %v507_v31, %v523_v35  ;;  %v2754_v43 = vsel %vm2677_vm5, %v38_v56, -1e+30 }
 0x1df   :  { %562 = vmax.xlane.f32.xlu0 %v2616_v32  ;;  %v2733_v44 = vadd.f32 %v538_v24, %v2729_v40  ;;  %v524_v46 = vmul.f32 0.2, %v508_v39 }
 0x1e0   :  { %v488_v41 = vpop.permute.xlu0 %487  ;;  %v2742_v52 = vadd.f32 %v539_v30, %v2738_v48 }
 0x1e1   :  { %v509_v47 = vadd.f32 %v2560_v6, %v488_v41  ;;  %v540_v37 = vmax.f32 %v508_v39, %v524_v46 }
 0x1e3   :  { %564 = vmax.xlane.f32.xlu0 %v2629_v38  ;;  %v525_v53 = vmul.f32 0.2, %v509_v47  ;;  %v2750_v57 = vadd.f32 %v540_v37, %v2746_v54 }
 0x1e5   :  { %v541_v6 = vmax.f32 %v509_v47, %v525_v53 }
 0x1e7   :  { %566 = vmax.xlane.f32.xlu0 %v2641_v45  ;;  %v2758_v59 = vadd.f32 %v541_v6, %v2754_v43 }
 0x1eb   :  { %568 = vmax.xlane.f32.xlu0 %v2653_v51 }
 0x1ef   :  { %570 = vmax.xlane.f32.xlu0 %v2666_v58 }
 0x1f3   :  { %572 = vmax.xlane.f32.xlu0 %v2682_v5 }
 0x1f7   :  { %574 = vmax.xlane.f32.xlu0 %v2693_v1 }
 0x1fb   :  { %576 = vmax.xlane.f32.xlu0 %v2703_v8 }
 0x1ff   :  { %578 = vmax.xlane.f32.xlu0 %v2714_v17 }
 0x203   :  { %580 = vmax.xlane.f32.xlu0 %v2724_v3 }
 0x207   :  { %582 = vmax.xlane.f32.xlu0 %v2733_v44 }
 0x20b   :  { %584 = vmax.xlane.f32.xlu0 %v2742_v52 }
 0x20f   :  { %586 = vmax.xlane.f32.xlu0 %v2750_v57 }
 0x213   :  { %588 = vmax.xlane.f32.xlu0 %v2758_v59 }
 0x264   :  { %v559_v60 = vpop.xlane.xlu0 %558 }
 0x265   :  { %v590_v50 = vsub.f32 %v2586_v19, %v559_v60 }
 0x267   :  { %v606_v61 = vmul.f32 1.442695, %v590_v50 }
 0x268   :  { %v561_v7 = vpop.xlane.xlu0 %560 }
 0x269   :  { %2282 = vpow2.f32 %v606_v61  ;;  %v591_v10 = vsub.f32 %v2601_v25, %v561_v7 }
 0x26b   :  { %v608_v11 = vmul.f32 1.442695, %v591_v10 }
 0x26c   :  { %v563_v9 = vpop.xlane.xlu0 %562 }
 0x26d   :  { %2284 = vpow2.f32 %v608_v11  ;;  %v592_v56 = vsub.f32 %v2616_v32, %v563_v9 }
 0x26f   :  { %v610_v63 = vmul.f32 1.442695, %v592_v56 }
 0x270   :  { %v565_v13 = vpop.xlane.xlu0 %564 }
 0x271   :  { %2286 = vpow2.f32 %v610_v63  ;;  %v593_v14 = vsub.f32 %v2629_v38, %v565_v13 }
 0x273   :  { %v2283_v16 = vpop.eup %2282  ;;  %v612_v0 = vmul.f32 1.442695, %v593_v14 }
 0x274   :  { %638 = vadd.xlane.f32.xlu1 %v2283_v16  ;;  %2079 = vmatprep.mubr.f32.mxu1 %v2283_v16  ;;  %v567_v19 = vpop.xlane.xlu0 %566 }
 0x275   :  { %2288 = vpow2.f32 %v612_v0  ;;  %v594_v20 = vsub.f32 %v2641_v45, %v567_v19 }
 0x277   :  { %v2285_v21 = vpop.eup %2284  ;;  %v614_v25 = vmul.f32 1.442695, %v594_v20 }
 0x278   :  { %640 = vadd.xlane.f32.xlu0 %v2285_v21  ;;  %v569_v22 = vpop.xlane.xlu0 %568  ;;  %2080 = vmatmul.mubr.f32.vlgmr.msra.gmra.mrb[0].mxu1 %v2285_v21 }
 0x279   :  { %2290 = vpow2.f32 %v614_v25  ;;  %v595_v32 = vsub.f32 %v2653_v51, %v569_v22 }
 0x27b   :  { %v2287_v27 = vpop.eup %2286  ;;  %v616_v28 = vmul.f32 1.442695, %v595_v32 }
 0x27c   :  { %642 = vadd.xlane.f32.xlu0 %v2287_v27  ;;  %v571_v38 = vpop.xlane.xlu0 %570  ;;  %2082 = vmatprep.mubr.f32.mxu1 %v2287_v27  ;;  %v124_v27 = vld [vmem:[%s3080_s2 + $0x10] sm:$0xff] }
 0x27d   :  { %2292 = vpow2.f32 %v616_v28  ;;  %v596_v31 = vsub.f32 %v2666_v58, %v571_v38 }
 0x27f   :  { %v2289_v33 = vpop.eup %2288  ;;  %v618_v24 = vmul.f32 1.442695, %v596_v31 }
 0x280   :  { %644 = vadd.xlane.f32.xlu0 %v2289_v33  ;;  %v573_v45 = vpop.xlane.xlu0 %572  ;;  %2083 = vmatmul.mubr.f32.gmra.mrb[2].mxu1 %v2289_v33 }
 0x281   :  { %2294 = vpow2.f32 %v618_v24  ;;  %v597_v35 = vsub.f32 %v2682_v5, %v573_v45 }
 0x283   :  { %v2291_v39 = vpop.eup %2290  ;;  %v620_v41 = vmul.f32 1.442695, %v597_v35 }
 0x284   :  { %646 = vadd.xlane.f32.xlu0 %v2291_v39  ;;  %v575_v51 = vpop.xlane.xlu0 %574  ;;  %2085 = vmatprep.mubr.f32.mxu1 %v2291_v39 }
 0x285   :  { %2296 = vpow2.f32 %v620_v41  ;;  %v598_v30 = vsub.f32 %v2693_v1, %v575_v51 }
 0x287   :  { %v2293_v46 = vpop.eup %2292  ;;  %v622_v47 = vmul.f32 1.442695, %v598_v30 }
 0x288   :  { %648 = vadd.xlane.f32.xlu0 %v2293_v46  ;;  %v577_v58 = vpop.xlane.xlu0 %576  ;;  %2086 = vmatmul.mubr.f32.gmra.mrb[4].mxu1 %v2293_v46 }
 0x289   :  { %2298 = vpow2.f32 %v622_v47  ;;  %v599_v37 = vsub.f32 %v2703_v8, %v577_v58 }
 0x28b   :  { %v2295_v53 = vpop.eup %2294  ;;  %v624_v6 = vmul.f32 1.442695, %v599_v37 }
 0x28c   :  { %650 = vadd.xlane.f32.xlu0 %v2295_v53  ;;  %v579_v5 = vpop.xlane.xlu0 %578  ;;  %2088 = vmatprep.mubr.f32.mxu1 %v2295_v53  ;;  %v1885_v53 = vld [vmem:[%s3080_s2 + $0x30] ss:$8 sm:$0x3] }
 0x28d   :  { %2300 = vpow2.f32 %v624_v6  ;;  %v600_v60 = vsub.f32 %v2714_v17, %v579_v5 }
 0x28f   :  { %v2297_v50 = vpop.eup %2296  ;;  %v626_v61 = vmul.f32 1.442695, %v600_v60  ;;  %v2787_v60 = vrot.slane %v1885_v53, %v2554_v4 }
 0x290   :  { %652 = vadd.xlane.f32.xlu0 %v2297_v50  ;;  %v581_v1 = vpop.xlane.xlu0 %580  ;;  %2089 = vmatmul.mubr.f32.gmra.mrb[6].mxu1 %v2297_v50 }
 0x291   :  { %2302 = vpow2.f32 %v626_v61  ;;  %v601_v7 = vsub.f32 %v2724_v3, %v581_v1 }
 0x293   :  { %v2299_v10 = vpop.eup %2298  ;;  %v628_v11 = vmul.f32 1.442695, %v601_v7 }
 0x294   :  { %654 = vadd.xlane.f32.xlu0 %v2299_v10  ;;  %v583_v8 = vpop.xlane.xlu0 %582  ;;  %2091 = vmatprep.mubr.f32.mxu1 %v2299_v10 }
 0x295   :  { %2304 = vpow2.f32 %v628_v11  ;;  %v602_v9 = vsub.f32 %v2733_v44, %v583_v8 }
 0x297   :  { %v2301_v56 = vpop.eup %2300  ;;  %v630_v63 = vmul.f32 1.442695, %v602_v9 }
 0x298   :  { %656 = vadd.xlane.f32.xlu0 %v2301_v56  ;;  %v585_v17 = vpop.xlane.xlu0 %584  ;;  %2092 = vmatmul.mubr.f32.gmra.mrb[8].mxu1 %v2301_v56 }
 0x299   :  { %2306 = vpow2.f32 %v630_v63  ;;  %v603_v13 = vsub.f32 %v2742_v52, %v585_v17 }
 0x29b   :  { %v2303_v14 = vpop.eup %2302  ;;  %v632_v16 = vmul.f32 1.442695, %v603_v13 }
 0x29c   :  { %658 = vadd.xlane.f32.xlu0 %v2303_v14  ;;  %v587_v3 = vpop.xlane.xlu0 %586  ;;  %2094 = vmatprep.mubr.f32.mxu1 %v2303_v14 }
 0x29d   :  { %2308 = vpow2.f32 %v632_v16  ;;  %v604_v0 = vsub.f32 %v2750_v57, %v587_v3 }
 0x29f   :  { %v2305_v19 = vpop.eup %2304  ;;  %v634_v20 = vmul.f32 1.442695, %v604_v0 }
 0x2a0   :  { %660 = vadd.xlane.f32.xlu1 %v2305_v19  ;;  %v589_v44 = vpop.xlane.xlu0 %588  ;;  %2095 = vmatmul.mubr.f32.gmra.mrb[10].mxu1 %v2305_v19 }
 0x2a1   :  { %2310 = vpow2.f32 %v634_v20  ;;  %v605_v21 = vsub.f32 %v2758_v59, %v589_v44  ;;  %v125_v59 = vld [vmem:[%s3080_s2 + $0x20] sm:$0xff] }
 0x2a2   :  { %v2219_v28 = vpack.c.bf16 %v125_v59, %v124_v27 }
 0x2a3   :  { %v2307_v25 = vpop.eup %2306  ;;  %v636_v22 = vmul.f32 1.442695, %v605_v21 }
 0x2a4   :  { %662 = vadd.xlane.f32.xlu0 %v2307_v25  ;;  %2097 = vmatprep.mubr.f32.mxu1 %v2307_v25 }
 0x2a5   :  { %2312 = vpow2.f32 %v636_v22  ;;  %2220 = vmatprep.subr.bf16.mxu0 %v2219_v28 }
 0x2a6   :  { %2222 = vmatpush3.bf16.msra.mxu0 %v2219_v28 }
 0x2a7   :  { %v2309_v52 = vpop.eup %2308 }
 0x2a8   :  { %664 = vadd.xlane.f32.xlu1 %v2309_v52  ;;  %2098 = vmatmul.mubr.f32.gmra.mrb[12].mxu1 %v2309_v52 }
 0x2ab   :  { %v2311_v32 = vpop.eup %2310 }
 0x2ac   :  { %666 = vadd.xlane.f32.xlu0 %v2311_v32  ;;  %2100 = vmatprep.mubr.f32.mxu1 %v2311_v32 }
 0x2af   :  { %v2313_v57 = vpop.eup %2312 }
 0x2b0   :  { %668 = vadd.xlane.f32.xlu1 %v2313_v57  ;;  %2101 = vmatmul.mubr.f32.gmra.mrb[14].mxu1 %v2313_v57 }
 0x301   :  { %v639_v24 = vpop.xlane.xlu1 %638 }
 0x305   :  { %v641_v38 = vpop.xlane.xlu0 %640 }
 0x306   :  { %2314 = vrcp.f32 %v641_v38 }
 0x307   :  { %2316 = vrcp.f32 %v639_v24 }
 0x309   :  { %v643_v31 = vpop.xlane.xlu0 %642 }
 0x30d   :  { %v645_v33 = vpop.xlane.xlu0 %644 }
 0x30e   :  { %2318 = vrcp.f32 %v645_v33 }
 0x30f   :  { %2320 = vrcp.f32 %v643_v31 }
 0x310   :  { %v2315_v39 = vpop.eup %2314 }
 0x311   :  { %v647_v45 = vpop.xlane.xlu0 %646  ;;  %v2317_v41 = vpop.eup %2316  ;;  %v687_v30 = vmul.f32 %v2315_v39, %v641_v38 }
 0x312   :  { %v686_v46 = vmul.f32 %v2317_v41, %v639_v24 }
 0x313   :  { %v703_v47 = vsub.f32 2.0, %v687_v30 }
 0x314   :  { %v702_v6 = vsub.f32 2.0, %v686_v46 }
 0x315   :  { %v649_v35 = vpop.xlane.xlu0 %648  ;;  %v719_v61 = vmul.f32 %v2315_v39, %v703_v47 }
 0x316   :  { %2322 = vrcp.f32 %v649_v35  ;;  %v718_v10 = vmul.f32 %v2317_v41, %v702_v6 }
 0x317   :  { %2324 = vrcp.f32 %v647_v45 }
 0x318   :  { %v2319_v37 = vpop.eup %2318 }
 0x319   :  { %v651_v51 = vpop.xlane.xlu0 %650  ;;  %v2321_v5 = vpop.eup %2320  ;;  %v689_v50 = vmul.f32 %v2319_v37, %v645_v33 }
 0x31a   :  { %v688_v1 = vmul.f32 %v2321_v5, %v643_v31 }
 0x31b   :  { %v705_v63 = vsub.f32 2.0, %v689_v50 }
 0x31c   :  { %v704_v14 = vsub.f32 2.0, %v688_v1 }
 0x31d   :  { %v653_v58 = vpop.xlane.xlu0 %652  ;;  %v721_v21 = vmul.f32 %v2319_v37, %v705_v63 }
 0x31e   :  { %2326 = vrcp.f32 %v653_v58  ;;  %v720_v52 = vmul.f32 %v2321_v5, %v704_v14 }
 0x31f   :  { %2328 = vrcp.f32 %v651_v51 }
 0x320   :  { %v2323_v13 = vpop.eup %2322 }
 0x321   :  { %v655_v11 = vpop.xlane.xlu0 %654  ;;  %v2325_v3 = vpop.eup %2324  ;;  %v691_v19 = vmul.f32 %v2323_v13, %v649_v35 }
 0x322   :  { %v690_v25 = vmul.f32 %v2325_v3, %v647_v45 }
 0x323   :  { %v707_v59 = vsub.f32 2.0, %v691_v19 }
 0x324   :  { %v706_v31 = vsub.f32 2.0, %v690_v25 }
 0x325   :  { %v657_v20 = vpop.xlane.xlu0 %656  ;;  %v723_v30 = vmul.f32 %v2323_v13, %v707_v59 }
 0x326   :  { %2330 = vrcp.f32 %v657_v20  ;;  %v722_v53 = vmul.f32 %v2325_v3, %v706_v31 }
 0x327   :  { %2332 = vrcp.f32 %v655_v11 }
 0x328   :  { %v2327_v38 = vpop.eup %2326 }
 0x329   :  { %v2329_v24 = vpop.eup %2328  ;;  %v693_v35 = vmul.f32 %v2327_v38, %v653_v58  ;;  %v659_v47 = vpop.xlane.xlu0 %658 }
 0x32a   :  { %v692_v46 = vmul.f32 %v2329_v24, %v651_v51 }
 0x32d   :  { %v661_v39 = vpop.xlane.xlu1 %660 }
 0x32e   :  { %2334 = vrcp.f32 %v661_v39 }
 0x32f   :  { %2336 = vrcp.f32 %v659_v47 }
 0x330   :  { %v2331_v58 = vpop.eup %2330 }
 0x331   :  { %v2333_v51 = vpop.eup %2332  ;;  %v663_v14 = vpop.xlane.xlu0 %662 }
 0x332   :  { %v694_v13 = vmul.f32 %v2333_v51, %v655_v11 }
 0x339   :  { %v667_v31 = vpop.xlane.xlu0 %666 }
 0x34b   :  { %v2081_v7 = vpop.f32.mrb[0].mxu1 }
 0x34c   :  { %v880_v8 = vmul.f32 %v2081_v7, %v719_v61  ;;  %v800_v9 = vpop.f32.mrb[1].mxu1  ;;  %v709_v61 = vsub.f32 2.0, %v693_v35  ;;  %v708_v7 = vsub.f32 2.0, %v692_v46 }
 0x34d   :  { %v879_v56 = vmul.f32 %v800_v9, %v718_v10  ;;  %v695_v9 = vmul.f32 %v2331_v58, %v657_v20  ;;  %v2335_v20 = vpop.eup %2334 }
 0x34e   :  { %v902_v17 = vadd.f32 %v2787_v60, %v880_v8  ;;  %v724_v3 = vmul.f32 %v2329_v24, %v708_v7  ;;  %v2337_v11 = vpop.eup %2336 }
 0x34f   :  { %v901_v16 = vadd.f32 %v2787_v60, %v879_v56  ;;  %v665_v56 = vpop.xlane.xlu1 %664 }
 0x350   :  { %v918_v44 = vmax.f32 %v902_v17, 0.0  ;;  %v725_v17 = vmul.f32 %v2327_v38, %v709_v61  ;;  %2338 = vrcp.f32 %v665_v56  ;;  %v696_v38 = vmul.f32 %v2337_v11, %v659_v47 }
 0x351   :  { %v917_v0 = vmax.f32 %v901_v16, 0.0  ;;  %2340 = vrcp.f32 %v663_v14 }
 0x353   :  { %v2084_v22 = vpop.f32.mrb[2].mxu1  ;;  %2107 = vmatprep.mubr.msk.f32.mxu0 %vm933_vm6, %v917_v0 }
 0x354   :  { %v882_v32 = vmul.f32 %v2084_v22, %v721_v21  ;;  %v810_v57 = vpop.f32.mrb[3].mxu1  ;;  %2108 = vmatmul.mubr.msk.f32.vlgmr.msra.gmra.mrb[16].mxu0 %vm933_vm6, %v918_v44  ;;  %v711_v21 = vsub.f32 2.0, %v695_v9  ;;  %v710_v22 = vsub.f32 2.0, %v694_v13 }
 0x355   :  { %v881_v27 = vmul.f32 %v810_v57, %v720_v52  ;;  %v697_v57 = vmul.f32 %v2335_v20, %v661_v39 }
 0x356   :  { %v904_v28 = vadd.f32 %v2787_v60, %v882_v32  ;;  %v726_v24 = vmul.f32 %v2333_v51, %v710_v22 }
 0x357   :  { %v903_v33 = vadd.f32 %v2787_v60, %v881_v27  ;;  %v669_v27 = vpop.xlane.xlu1 %668 }
 0x358   :  { %v920_v41 = vmax.f32 %v904_v28, 0.0  ;;  %v727_v28 = vmul.f32 %v2331_v58, %v711_v21  ;;  %2342 = vrcp.f32 %v669_v27 }
 0x359   :  { %v919_v45 = vmax.f32 %v903_v33, 0.0  ;;  %2344 = vrcp.f32 %v667_v31 }
 0x35a   :  { %v2339_v39 = vpop.eup %2338 }
 0x35b   :  { %v2087_v37 = vpop.f32.mrb[4].mxu1  ;;  %2110 = vmatprep.mubr.msk.f32.mxu0 %vm933_vm6, %v919_v45  ;;  %v2341_v47 = vpop.eup %2340 }
 0x35c   :  { %v884_v6 = vmul.f32 %v2087_v37, %v723_v30  ;;  %v820_v5 = vpop.f32.mrb[5].mxu1  ;;  %2111 = vmatmul.mubr.msk.f32.gmra.mrb[18].mxu0 %vm933_vm6, %v920_v41  ;;  %v713_v30 = vsub.f32 2.0, %v697_v57  ;;  %v712_v37 = vsub.f32 2.0, %v696_v38 }
 0x35d   :  { %v883_v50 = vmul.f32 %v820_v5, %v722_v53  ;;  %v699_v5 = vmul.f32 %v2339_v39, %v665_v56 }
 0x35e   :  { %v906_v1 = vadd.f32 %v2787_v60, %v884_v6  ;;  %v729_v61 = vmul.f32 %v2335_v20, %v713_v30  ;;  %v728_v7 = vmul.f32 %v2337_v11, %v712_v37 }
 0x35f   :  { %v905_v10 = vadd.f32 %v2787_v60, %v883_v50  ;;  %v715_v9 = vsub.f32 2.0, %v699_v5 }
 0x360   :  { %v922_v63 = vmax.f32 %v906_v1, 0.0  ;;  %v698_v1 = vmul.f32 %v2341_v47, %v663_v14 }
 0x361   :  { %v921_v8 = vmax.f32 %v905_v10, 0.0 }
 0x362   :  { %v714_v13 = vsub.f32 2.0, %v698_v1 }
 0x363   :  { %v2090_v16 = vpop.f32.mrb[6].mxu1  ;;  %2113 = vmatprep.mubr.msk.f32.mxu0 %vm933_vm6, %v921_v8 }
 0x364   :  { %v886_v0 = vmul.f32 %v2090_v16, %v725_v17  ;;  %v830_v19 = vpop.f32.mrb[7].mxu1  ;;  %2114 = vmatmul.mubr.msk.f32.gmra.mrb[20].mxu0 %vm933_vm6, %v922_v63  ;;  %v2343_v17 = vpop.eup %2342 }
 0x365   :  { %v885_v44 = vmul.f32 %v830_v19, %v724_v3  ;;  %v2345_v56 = vpop.eup %2344  ;;  %v731_v19 = vmul.f32 %v2339_v39, %v715_v9 }
 0x366   :  { %v908_v25 = vadd.f32 %v2787_v60, %v886_v0  ;;  %v701_v0 = vmul.f32 %v2343_v17, %v669_v27 }
 0x367   :  { %v907_v52 = vadd.f32 %v2787_v60, %v885_v44  ;;  %v700_v44 = vmul.f32 %v2345_v56, %v667_v31 }
 0x368   :  { %v924_v59 = vmax.f32 %v908_v25, 0.0  ;;  %v730_v25 = vmul.f32 %v2341_v47, %v714_v13  ;;  %v717_v11 = vsub.f32 2.0, %v701_v0 }
 0x369   :  { %v923_v32 = vmax.f32 %v907_v52, 0.0  ;;  %v716_v57 = vsub.f32 2.0, %v700_v44 }
 0x36a   :  { %v733_v38 = vmul.f32 %v2343_v17, %v717_v11 }
 0x36b   :  { %v2093_v33 = vpop.f32.mrb[8].mxu1  ;;  %2116 = vmatprep.mubr.msk.f32.mxu0 %vm933_vm6, %v923_v32  ;;  %v732_v31 = vmul.f32 %v2345_v56, %v716_v57 }
 0x36c   :  { %v888_v45 = vmul.f32 %v2093_v33, %v727_v28  ;;  %v840_v35 = vpop.f32.mrb[9].mxu1  ;;  %2117 = vmatmul.mubr.msk.f32.gmra.mrb[22].mxu0 %vm933_vm6, %v924_v59 }
 0x36d   :  { %v887_v41 = vmul.f32 %v840_v35, %v726_v24 }
 0x36e   :  { %v910_v46 = vadd.f32 %v2787_v60, %v888_v45 }
 0x36f   :  { %v909_v53 = vadd.f32 %v2787_v60, %v887_v41 }
 0x370   :  { %v926_v50 = vmax.f32 %v910_v46, 0.0 }
 0x371   :  { %v925_v6 = vmax.f32 %v909_v53, 0.0 }
 0x373   :  { %v2096_v58 = vpop.f32.mrb[10].mxu1  ;;  %2119 = vmatprep.mubr.msk.f32.mxu0 %vm933_vm6, %v925_v6 }
 0x374   :  { %v890_v10 = vmul.f32 %v2096_v58, %v729_v61  ;;  %v850_v51 = vpop.f32.mrb[11].mxu1  ;;  %2120 = vmatmul.mubr.msk.f32.gmra.mrb[24].mxu0 %vm933_vm6, %v926_v50 }
 0x375   :  { %v889_v8 = vmul.f32 %v850_v51, %v728_v7 }
 0x376   :  { %v912_v63 = vadd.f32 %v2787_v60, %v890_v10 }
 0x377   :  { %v911_v16 = vadd.f32 %v2787_v60, %v889_v8 }
 0x378   :  { %v928_v14 = vmax.f32 %v912_v63, 0.0 }
 0x379   :  { %v927_v3 = vmax.f32 %v911_v16, 0.0 }
 0x37b   :  { %v2099_v21 = vpop.f32.mrb[12].mxu1  ;;  %2122 = vmatprep.mubr.msk.f32.mxu0 %vm933_vm6, %v927_v3 }
 0x37c   :  { %v892_v20 = vmul.f32 %v2099_v21, %v731_v19  ;;  %v860_v22 = vpop.f32.mrb[13].mxu1  ;;  %2123 = vmatmul.mubr.msk.f32.gmra.mrb[26].mxu0 %vm933_vm6, %v928_v14 }
 0x37d   :  { %v891_v52 = vmul.f32 %v860_v22, %v730_v25 }
 0x37e   :  { %v914_v32 = vadd.f32 %v2787_v60, %v892_v20 }
 0x37f   :  { %v913_v59 = vadd.f32 %v2787_v60, %v891_v52 }
 0x380   :  { %v930_v27 = vmax.f32 %v914_v32, 0.0 }
 0x381   :  { %v929_v28 = vmax.f32 %v913_v59, 0.0 }
 0x383   :  { %v2102_v33 = vpop.f32.mrb[14].mxu1  ;;  %2125 = vmatprep.mubr.msk.f32.mxu0 %vm933_vm6, %v929_v28 }
 0x384   :  { %v894_v24 = vmul.f32 %v2102_v33, %v733_v38  ;;  %v870_v45 = vpop.f32.mrb[15].mxu1  ;;  %2126 = vmatmul.mubr.msk.f32.gmra.mrb[28].mxu0 %vm933_vm6, %v930_v27 }
 0x385   :  { %v893_v35 = vmul.f32 %v870_v45, %v732_v31 }
 0x386   :  { %v916_v41 = vadd.f32 %v2787_v60, %v894_v24 }
 0x387   :  { %v915_v30 = vadd.f32 %v2787_v60, %v893_v35 }
 0x388   :  { %v932_v39 = vmax.f32 %v916_v41, 0.0 }
 0x389   :  { %v931_v46 = vmax.f32 %v915_v30, 0.0 }
 0x38b   :  { %2128 = vmatprep.mubr.msk.f32.mxu0 %vm933_vm6, %v931_v46 }
 0x38c   :  { %2129 = vmatmul.mubr.msk.f32.gmra.mrb[30].mxu0 %vm933_vm6, %v932_v39 }
 0x427   :  { %v2109_v37 = vpop.f32.mrb[16].mxu0 }
 0x428   :  { %1145 = vrot.lane.b32.xlu1 %v2109_v37, %s2435_s19  ;;  %v1048_v53 = vpop.f32.mrb[17].mxu0 }
 0x429   :  { %v2223_v47 = vpack.c.bf16 %v2109_v37, %v1048_v53  ;;  %1143 = vrot.lane.b32.xlu0 %v1048_v53, %s2435_s19 }
 0x42b   :  { %2224 = vmatprep.subr.bf16.mxu0 %v2223_v47  ;;  %2259 = vmatprep.subr.bf16.mxu1 %v2223_v47 }
 0x42c   :  { %1228 = vperm.xlu1 %2281, %v2109_v37   ;;  %2226 = vmatpush3.bf16.msra.mxu0 %v2223_v47 }
 0x42d   :  { %2267 = vmatpush3.bf16.msra.mxu1 %v2223_v47 }
 0x42f   :  { %v2112_v6 = vpop.f32.mrb[18].mxu0 }
 0x430   :  { %1224 = vperm.xlu1 %2281, %v1048_v53   ;;  %1149 = vrot.lane.b32.xlu0 %v2112_v6, %s2435_s19  ;;  %v1058_v60 = vpop.f32.mrb[19].mxu0 }
 0x431   :  { %v2227_v5 = vpack.c.bf16 %v2112_v6, %v1058_v60 }
 0x433   :  { %2228 = vmatprep.subr.bf16.mxu0 %v2227_v5  ;;  %2260 = vmatprep.subr.bf16.mxu1 %v2227_v5 }
 0x434   :  { %1147 = vrot.lane.b32.xlu1 %v1058_v60, %s2435_s19  ;;  %2230 = vmatpush3.bf16.msra.mxu0 %v2227_v5 }
 0x435   :  { %2268 = vmatpush3.bf16.msra.mxu1 %v2227_v5 }
 0x437   :  { %v2115_v50 = vpop.f32.mrb[20].mxu0 }
 0x438   :  { %1232 = vperm.xlu1 %2281, %v1058_v60   ;;  %1153 = vrot.lane.b32.xlu0 %v2115_v50, %s2435_s19  ;;  %v1068_v61 = vpop.f32.mrb[21].mxu0 }
 0x439   :  { %v2231_v1 = vpack.c.bf16 %v2115_v50, %v1068_v61 }
 0x43b   :  { %2232 = vmatprep.subr.bf16.mxu0 %v2231_v1  ;;  %2261 = vmatprep.subr.bf16.mxu1 %v2231_v1 }
 0x43c   :  { %1151 = vrot.lane.b32.xlu1 %v1068_v61, %s2435_s19  ;;  %2234 = vmatpush3.bf16.msra.mxu0 %v2231_v1 }
 0x43d   :  { %2269 = vmatpush3.bf16.msra.mxu1 %v2231_v1 }
 0x43f   :  { %v2118_v58 = vpop.f32.mrb[22].mxu0 }
 0x440   :  { %1157 = vrot.lane.b32.xlu0 %v2118_v58, %s2435_s19  ;;  %v1078_v7 = vpop.f32.mrb[23].mxu0 }
 0x441   :  { %v2235_v10 = vpack.c.bf16 %v2118_v58, %v1078_v7  ;;  %1155 = vrot.lane.b32.xlu1 %v1078_v7, %s2435_s19 }
 0x443   :  { %2236 = vmatprep.subr.bf16.mxu0 %v2235_v10  ;;  %2262 = vmatprep.subr.bf16.mxu1 %v2235_v10 }
 0x444   :  { %1252 = vperm.xlu0 %2280, %v2118_v58   ;;  %2238 = vmatpush3.bf16.msra.mxu0 %v2235_v10 }
 0x445   :  { %2270 = vmatpush3.bf16.msra.mxu1 %v2235_v10  ;;  %1248 = vperm.xlu1 %2281, %v1078_v7  }
 0x447   :  { %v2121_v51 = vpop.f32.mrb[24].mxu0 }
 0x448   :  { %1161 = vrot.lane.b32.xlu0 %v2121_v51, %s2435_s19  ;;  %v1088_v8 = vpop.f32.mrb[25].mxu0 }
 0x449   :  { %v2239_v9 = vpack.c.bf16 %v2121_v51, %v1088_v8  ;;  %1159 = vrot.lane.b32.xlu1 %v1088_v8, %s2435_s19 }
 0x44b   :  { %2240 = vmatprep.subr.bf16.mxu0 %v2239_v9  ;;  %2263 = vmatprep.subr.bf16.mxu1 %v2239_v9 }
 0x44c   :  { %1260 = vperm.xlu0 %2280, %v2121_v51   ;;  %2242 = vmatpush3.bf16.msra.mxu0 %v2239_v9 }
 0x44d   :  { %2271 = vmatpush3.bf16.msra.mxu1 %v2239_v9  ;;  %1256 = vperm.xlu1 %2281, %v1088_v8  }
 0x44f   :  { %v2124_v63 = vpop.f32.mrb[26].mxu0 }
 0x450   :  { %1165 = vrot.lane.b32.xlu0 %v2124_v63, %s2435_s19  ;;  %v1098_v17 = vpop.f32.mrb[27].mxu0 }
 0x451   :  { %v2243_v13 = vpack.c.bf16 %v2124_v63, %v1098_v17  ;;  %1163 = vrot.lane.b32.xlu1 %v1098_v17, %s2435_s19 }
 0x453   :  { %2244 = vmatprep.subr.bf16.mxu0 %v2243_v13  ;;  %2264 = vmatprep.subr.bf16.mxu1 %v2243_v13 }
 0x454   :  { %1268 = vperm.xlu0 %2280, %v2124_v63   ;;  %2246 = vmatpush3.bf16.msra.mxu0 %v2243_v13 }
 0x455   :  { %2272 = vmatpush3.bf16.msra.mxu1 %v2243_v13 }
 0x457   :  { %v2127_v16 = vpop.f32.mrb[28].mxu0 }
 0x458   :  { %1264 = vperm.xlu0 %2280, %v1098_v17   ;;  %v1108_v56 = vpop.f32.mrb[29].mxu0 }
 0x459   :  { %v2247_v3 = vpack.c.bf16 %v2127_v16, %v1108_v56  ;;  %1167 = vrot.lane.b32.xlu1 %v1108_v56, %s2435_s19 }
 0x45b   :  { %2248 = vmatprep.subr.bf16.mxu0 %v2247_v3  ;;  %2265 = vmatprep.subr.bf16.mxu1 %v2247_v3 }
 0x45c   :  { %1169 = vrot.lane.b32.xlu0 %v2127_v16, %s2435_s19  ;;  %2250 = vmatpush3.bf16.msra.mxu0 %v2247_v3 }
 0x45d   :  { %2273 = vmatpush3.bf16.msra.mxu1 %v2247_v3  ;;  %1236 = vperm.xlu1 %2281, %v2112_v6  }
 0x45f   :  { %v2130_v0 = vpop.f32.mrb[30].mxu0 }
 0x460   :  { %1173 = vrot.lane.b32.xlu0 %v2130_v0, %s2435_s19  ;;  %v1118_v14 = vpop.f32.mrb[31].mxu0 }
 0x461   :  { %v2251_v19 = vpack.c.bf16 %v2130_v0, %v1118_v14  ;;  %1240 = vperm.xlu1 %2281, %v1068_v61  }
 0x463   :  { %2252 = vmatprep.subr.bf16.mxu0 %v2251_v19  ;;  %2266 = vmatprep.subr.bf16.mxu1 %v2251_v19 }
 0x464   :  { %1272 = vperm.xlu0 %2280, %v1108_v56   ;;  %2254 = vmatpush3.bf16.msra.mxu0 %v2251_v19 }
 0x465   :  { %2274 = vmatpush3.bf16.msra.mxu1 %v2251_v19  ;;  %1244 = vperm.xlu1 %2281, %v2115_v50  }
 0x468   :  { %1276 = vperm.xlu0 %2280, %v2127_v16  }
 0x469   :  { %1171 = vrot.lane.b32.xlu1 %v1118_v14, %s2435_s19 }
 0x46c   :  { %1284 = vperm.xlu0 %2280, %v2130_v0  }
 0x470   :  { %1280 = vperm.xlu0 %2280, %v1118_v14  }
 0x49a   :  { %v1146_v21 = vpop.permute.xlu1 %1145 }
 0x49b   :  { %v1144_v44 = vpop.permute.xlu0 %1143 }
 0x49c   :  { %1191 = vxpose.xlu1.b32.start [1/16] (narrow) %v1144_v44, 8 }
 0x4a0   :  { %1192 = vxpose.xlu1.b32.cont [2/16] (narrow) %v1146_v21, 8 }
 0x4a2   :  { %v1150_v52 = vpop.permute.xlu0 %1149 }
 0x4aa   :  { %v1154_v32 = vpop.permute.xlu0 %1153 }
 0x4ab   :  { %v2837_v25 = vpop.permute.xlu1 %1228 }
 0x4af   :  { %v1225_v20 = vpop.permute.xlu1 %1224 }
 0x4b2   :  { %v1158_v59 = vpop.permute.xlu0 %1157 }
 0x4b3   :  { %v1148_v22 = vpop.permute.xlu1 %1147 }
 0x4b4   :  { %1193 = vxpose.xlu1.b32.cont [3/16] (narrow) %v1148_v22, 8 }
 0x4b7   :  { %v2839_v11 = vpop.permute.xlu1 %1232 }
 0x4b8   :  { %1194 = vxpose.xlu1.b32.cont [4/16] (narrow) %v1150_v52, 8 }
 0x4bb   :  { %v1152_v57 = vpop.permute.xlu1 %1151 }
 0x4bc   :  { %1195 = vxpose.xlu1.b32.cont [5/16] (narrow) %v1152_v57, 8 }
 0x4bf   :  { %v1156_v28 = vpop.permute.xlu1 %1155 }
 0x4c0   :  { %1196 = vxpose.xlu1.b32.cont [6/16] (narrow) %v1154_v32, 8 }
 0x4c3   :  { %v1253_v27 = vpop.permute.xlu0 %1252 }
 0x4c4   :  { %v1249_v38 = vpop.permute.xlu1 %1248  ;;  %1197 = vxpose.xlu1.b32.cont [7/16] (narrow) %v1156_v28, 8 }
 0x4c7   :  { %v1162_v33 = vpop.permute.xlu0 %1161 }
 0x4c8   :  { %v1160_v31 = vpop.permute.xlu1 %1159  ;;  %1198 = vxpose.xlu1.b32.cont [8/16] (narrow) %v1158_v59, 8 }
 0x4cb   :  { %v1261_v24 = vpop.permute.xlu0 %1260 }
 0x4cc   :  { %v1257_v45 = vpop.permute.xlu1 %1256  ;;  %1199 = vxpose.xlu1.b32.cont [9/16] (narrow) %v1160_v31, 8 }
 0x4cf   :  { %v1166_v35 = vpop.permute.xlu0 %1165 }
 0x4d0   :  { %1200 = vxpose.xlu1.b32.cont [10/16] (narrow) %v1162_v33, 8  ;;  %v1164_v41 = vpop.permute.xlu1 %1163 }
 0x4d3   :  { %v1269_v30 = vpop.permute.xlu0 %1268 }
 0x4d4   :  { %1201 = vxpose.xlu1.b32.cont [11/16] (narrow) %v1164_v41, 8  ;;  %v1168_v46 = vpop.permute.xlu1 %1167 }
 0x4d7   :  { %v1265_v39 = vpop.permute.xlu0 %1264 }
 0x4d8   :  { %1202 = vxpose.xlu1.b32.cont [12/16] (narrow) %v1166_v35, 8 }
 0x4db   :  { %v1170_v53 = vpop.permute.xlu0 %1169 }
 0x4dc   :  { %v1237_v37 = vpop.permute.xlu1 %1236  ;;  %1203 = vxpose.xlu1.b32.cont [13/16] (narrow) %v1168_v46, 8 }
 0x4df   :  { %v1174_v5 = vpop.permute.xlu0 %1173 }
 0x4e0   :  { %v2841_v47 = vpop.permute.xlu1 %1240  ;;  %1204 = vxpose.xlu1.b32.cont [14/16] (narrow) %v1170_v53, 8 }
 0x4e4   :  { %v2843_v6 = vpop.permute.xlu1 %1244 }
 0x4e8   :  { %v1172_v60 = vpop.permute.xlu1 %1171 }
 0x4e9   :  { %1205 = vxpose.xlu1.b32.cont [15/16] (narrow) %v1172_v60, 8 }
 0x4ed   :  { %1206 = vxpose.xlu1.b32.end [16/16] (narrow) %v1174_v5, 8 }
 0x531   :  { %v1207_v50 = vpop.trf.xlu1 }
 0x532   :  { %v2846_v61 = vrot.slane %v1207_v50, %v2554_v4 }
 0x534   :  { %v1297_v1 = vadd.f32 %v2846_v61, %v1249_v38  ;;  %v1298_v58 = vadd.f32 %v2846_v61, %v1253_v27  ;;  %v1299_v51 = vadd.f32 %v2846_v61, %v1257_v45  ;;  %v1300_v13 = vadd.f32 %v2846_v61, %v1261_v24 }
 0x535   :  { %v1291_v0 = vadd.f32 %v2846_v61, %v1225_v20  ;;  %v1301_v44 = vadd.f32 %v2846_v61, %v1265_v39  ;;  %v1292_v52 = vadd.f32 %v2846_v61, %v2837_v25  ;;  %v1302_v57 = vadd.f32 %v2846_v61, %v1269_v30  ;;  %v1273_v25 = vpop.permute.xlu0 %1272 }
 0x536   :  { %v1313_v7 = vmul.f32 0.2, %v1297_v1  ;;  %v1314_v10 = vmul.f32 0.2, %v1298_v58  ;;  %v1315_v17 = vmul.f32 0.2, %v1299_v51  ;;  %v1293_v27 = vadd.f32 %v2846_v61, %v2839_v11 }
 0x537   :  { %v1316_v3 = vmul.f32 0.2, %v1300_v13  ;;  %v1307_v19 = vmul.f32 0.2, %v1291_v0  ;;  %v1317_v22 = vmul.f32 0.2, %v1301_v44  ;;  %v1303_v31 = vadd.f32 %v2846_v61, %v1273_v25 }
 0x538   :  { %v1329_v8 = vmax.f32 %v1297_v1, %v1313_v7  ;;  %v1330_v63 = vmax.f32 %v1298_v58, %v1314_v10  ;;  %v1331_v56 = vmax.f32 %v1299_v51, %v1315_v17  ;;  %v1308_v32 = vmul.f32 0.2, %v1292_v52 }
 0x539   :  { %v1318_v28 = vmul.f32 0.2, %v1302_v57  ;;  %v1309_v33 = vmul.f32 0.2, %v1293_v27  ;;  %v1277_v24 = vpop.permute.xlu0 %1276  ;;  %v1319_v35 = vmul.f32 0.2, %v1303_v31  ;;  %v1294_v11 = vadd.f32 %v2846_v61, %v1237_v37 }
 0x53a   :  { %v2852_v9 = vadd.f32 %v1329_v8, %v2659_v55  ;;  %v2857_v16 = vadd.f32 %v1330_v63, %v2671_v62  ;;  %v2862_v14 = vadd.f32 %v1331_v56, %v2689_v12  ;;  %v1332_v55 = vmax.f32 %v1300_v13, %v1316_v3 }
 0x53b   :  { %v1323_v62 = vmax.f32 %v1291_v0, %v1307_v19  ;;  %v1333_v12 = vmax.f32 %v1301_v44, %v1317_v22  ;;  %v1334_v38 = vmax.f32 %v1302_v57, %v1318_v28  ;;  %v1325_v45 = vmax.f32 %v1293_v27, %v1309_v33 }
 0x53c   :  { %1367 = vmax.xlane.f32.xlu0 %v2852_v9  ;;  %v2867_v21 = vadd.f32 %v1332_v55, %v2699_v18  ;;  %v1324_v18 = vmax.f32 %v1292_v52, %v1308_v32  ;;  %v1310_v30 = vmul.f32 0.2, %v1294_v11  ;;  %v1304_v46 = vadd.f32 %v2846_v61, %v1277_v24 }
 0x53d   :  { %v2873_v20 = vadd.f32 %v1323_v62, %v2578_v15  ;;  %v2878_v59 = vadd.f32 %v1333_v12, %v2710_v26  ;;  %v2889_v26 = vadd.f32 %v1334_v38, %v2720_v34  ;;  %v2894_v41 = vadd.f32 %v1325_v45, %v2607_v29  ;;  %v1285_v39 = vpop.permute.xlu0 %1284 }
 0x53e   :  { %v2884_v15 = vadd.f32 %v1324_v18, %v2592_v23  ;;  %v1335_v23 = vmax.f32 %v1303_v31, %v1319_v35  ;;  %v1326_v34 = vmax.f32 %v1294_v11, %v1310_v30  ;;  %v1320_v60 = vmul.f32 0.2, %v1304_v46 }
 0x53f   :  { %v1295_v37 = vadd.f32 %v2846_v61, %v2841_v47  ;;  %v1296_v47 = vadd.f32 %v2846_v61, %v2843_v6  ;;  %v1306_v63 = vadd.f32 %v2846_v61, %v1285_v39 }
 0x540   :  { %1369 = vmax.xlane.f32.xlu0 %v2857_v16  ;;  %v2899_v53 = vadd.f32 %v1335_v23, %v2729_v40  ;;  %v2905_v29 = vadd.f32 %v1326_v34, %v2622_v36  ;;  %v1336_v50 = vmax.f32 %v1304_v46, %v1320_v60 }
 0x541   :  { %v1281_v5 = vpop.permute.xlu0 %1280  ;;  %v1311_v1 = vmul.f32 0.2, %v1295_v37  ;;  %v1312_v8 = vmul.f32 0.2, %v1296_v47  ;;  %v1322_v13 = vmul.f32 0.2, %v1306_v63 }
 0x542   :  { %v1305_v58 = vadd.f32 %v2846_v61, %v1281_v5  ;;  %v2910_v40 = vadd.f32 %v1336_v50, %v2738_v48 }
 0x543   :  { %v1327_v7 = vmax.f32 %v1295_v37, %v1311_v1  ;;  %v1328_v48 = vmax.f32 %v1296_v47, %v1312_v8  ;;  %v1338_v56 = vmax.f32 %v1306_v63, %v1322_v13 }
 0x544   :  { %1371 = vmax.xlane.f32.xlu0 %v2862_v14  ;;  %v1321_v10 = vmul.f32 0.2, %v1305_v58 }
 0x545   :  { %v2916_v51 = vadd.f32 %v1327_v7, %v2634_v42  ;;  %v2925_v6 = vadd.f32 %v1328_v48, %v2646_v49  ;;  %v2929_v42 = vadd.f32 %v1338_v56, %v2754_v43 }
 0x546   :  { %v1337_v36 = vmax.f32 %v1305_v58, %v1321_v10 }
 0x548   :  { %1373 = vmax.xlane.f32.xlu0 %v2867_v21  ;;  %v2921_v17 = vadd.f32 %v1337_v36, %v2746_v54 }
 0x54c   :  { %1355 = vmax.xlane.f32.xlu0 %v2873_v20 }
 0x550   :  { %1375 = vmax.xlane.f32.xlu0 %v2878_v59 }
 0x554   :  { %1357 = vmax.xlane.f32.xlu0 %v2884_v15 }
 0x558   :  { %1377 = vmax.xlane.f32.xlu0 %v2889_v26 }
 0x55c   :  { %1359 = vmax.xlane.f32.xlu0 %v2894_v41 }
 0x560   :  { %1379 = vmax.xlane.f32.xlu0 %v2899_v53 }
 0x564   :  { %1361 = vmax.xlane.f32.xlu0 %v2905_v29 }
 0x568   :  { %1381 = vmax.xlane.f32.xlu0 %v2910_v40 }
 0x56c   :  { %1363 = vmax.xlane.f32.xlu0 %v2916_v51 }
 0x570   :  { %1383 = vmax.xlane.f32.xlu0 %v2921_v17 }
 0x574   :  { %1365 = vmax.xlane.f32.xlu0 %v2925_v6 }
 0x578   :  { %1385 = vmax.xlane.f32.xlu0 %v2929_v42 }
 0x5c9   :  { %v1368_v61 = vpop.xlane.xlu0 %1367 }
 0x5ca   :  { %v1393_v3 = vsub.f32 %v2852_v9, %v1368_v61 }
 0x5cc   :  { %v1415_v54 = vmul.f32 1.442695, %v1393_v3 }
 0x5cd   :  { %v1370_v0 = vpop.xlane.xlu0 %1369 }
 0x5ce   :  { %2346 = vpow2.f32 %v1415_v54  ;;  %v1394_v55 = vsub.f32 %v2857_v16, %v1370_v0 }
 0x5d0   :  { %v1417_v19 = vmul.f32 1.442695, %v1394_v55  ;;  %v130_v55 = vld [vmem:[%s3080_s2 + $0x50] sm:$0xff] }
 0x5d1   :  { %v1372_v44 = vpop.xlane.xlu0 %1371 }
 0x5d2   :  { %2348 = vpow2.f32 %v1417_v19  ;;  %v1395_v49 = vsub.f32 %v2862_v14, %v1372_v44  ;;  %v132_v44 = vld [vmem:[%s3080_s2 + $0x60] sm:$0xff] }
 0x5d4   :  { %v1419_v62 = vmul.f32 1.442695, %v1395_v49  ;;  %v2437_v49 = vmov 0.0  }
 0x5d5   :  { %v1374_v22 = vpop.xlane.xlu0 %1373 }
 0x5d6   :  { %2350 = vpow2.f32 %v1419_v62  ;;  %v1396_v43 = vsub.f32 %v2867_v21, %v1374_v22  ;;  %v2257_v62 = vpack.c.bf16 %v132_v44, %v130_v55 }
 0x5d8   :  { %v2936_v52 = vpop.eup %2346  ;;  %v1421_v12 = vmul.f32 1.442695, %v1396_v43 }
 0x5d9   :  { %2172 = vmatprep.mubr.f32.mxu1 %v2936_v52  ;;  %v1356_v9 = vpop.xlane.xlu0 %1355 }
 0x5da   :  { %2352 = vpow2.f32 %v1421_v12  ;;  %v1387_v32 = vsub.f32 %v2873_v20, %v1356_v9 }
 0x5dc   :  { %v2940_v16 = vpop.eup %2348  ;;  %v1403_v57 = vmul.f32 1.442695, %v1387_v32 }
 0x5dd   :  { %v1376_v18 = vpop.xlane.xlu0 %1375  ;;  %2173 = vmatmul.mubr.f32.vlgmr.msra.gmra.mrb[16].mxu1 %v2940_v16 }
 0x5de   :  { %2354 = vpow2.f32 %v1403_v57  ;;  %v1397_v14 = vsub.f32 %v2878_v59, %v1376_v18 }
 0x5e0   :  { %v2944_v28 = vpop.eup %2350  ;;  %v1423_v21 = vmul.f32 1.442695, %v1397_v14 }
 0x5e1   :  { %v1358_v27 = vpop.xlane.xlu0 %1357  ;;  %2175 = vmatprep.mubr.f32.mxu1 %v2944_v28 }
 0x5e2   :  { %2356 = vpow2.f32 %v1423_v21  ;;  %v1388_v25 = vsub.f32 %v2884_v15, %v1358_v27 }
 0x5e4   :  { %v2948_v38 = vpop.eup %2352  ;;  %v1405_v20 = vmul.f32 1.442695, %v1388_v25 }
 0x5e5   :  { %v1378_v33 = vpop.xlane.xlu0 %1377  ;;  %2176 = vmatmul.mubr.f32.gmra.mrb[18].mxu1 %v2948_v38 }
 0x5e6   :  { %2358 = vpow2.f32 %v1405_v20  ;;  %v1398_v31 = vsub.f32 %v2889_v26, %v1378_v33 }
 0x5e8   :  { %v2355_v24 = vpop.eup %2354  ;;  %v1425_v59 = vmul.f32 1.442695, %v1398_v31 }
 0x5e9   :  { %1435 = vadd.xlane.f32.xlu0 %v2355_v24  ;;  %2163 = vmatprep.mubr.f32.mxu0 %v2355_v24  ;;  %v1360_v45 = vpop.xlane.xlu0 %1359 }
 0x5ea   :  { %2360 = vpow2.f32 %v1425_v59  ;;  %v1389_v35 = vsub.f32 %v2894_v41, %v1360_v45 }
 0x5ec   :  { %v2357_v11 = vpop.eup %2356  ;;  %v1407_v23 = vmul.f32 1.442695, %v1389_v35 }
 0x5ed   :  { %v1380_v15 = vpop.xlane.xlu0 %1379  ;;  %2178 = vmatprep.mubr.f32.mxu1 %v2357_v11 }
 0x5ee   :  { %2362 = vpow2.f32 %v1407_v23  ;;  %v1399_v30 = vsub.f32 %v2899_v53, %v1380_v15 }
 0x5f0   :  { %v2359_v46 = vpop.eup %2358  ;;  %v1427_v39 = vmul.f32 1.442695, %v1399_v30 }
 0x5f1   :  { %1437 = vadd.xlane.f32.xlu0 %v2359_v46  ;;  %v1362_v34 = vpop.xlane.xlu0 %1361  ;;  %2164 = vmatmul.mubr.f32.vlgmr.msra.gmra.mrb[32].mxu0 %v2359_v46 }
 0x5f2   :  { %2364 = vpow2.f32 %v1427_v39  ;;  %v1390_v26 = vsub.f32 %v2905_v29, %v1362_v34 }
 0x5f4   :  { %v2361_v60 = vpop.eup %2360  ;;  %v1409_v37 = vmul.f32 1.442695, %v1390_v26 }
 0x5f5   :  { %v1382_v5 = vpop.xlane.xlu0 %1381  ;;  %2179 = vmatmul.mubr.f32.gmra.mrb[20].mxu1 %v2361_v60 }
 0x5f6   :  { %2366 = vpow2.f32 %v1409_v37  ;;  %v1400_v41 = vsub.f32 %v2910_v40, %v1382_v5 }
 0x5f8   :  { %v2363_v50 = vpop.eup %2362  ;;  %v1429_v1 = vmul.f32 1.442695, %v1400_v41 }
 0x5f9   :  { %1439 = vadd.xlane.f32.xlu1 %v2363_v50  ;;  %v1364_v58 = vpop.xlane.xlu0 %1363  ;;  %2166 = vmatprep.mubr.f32.mxu0 %v2363_v50 }
 0x5fa   :  { %2368 = vpow2.f32 %v1429_v1  ;;  %v1391_v53 = vsub.f32 %v2916_v51, %v1364_v58  ;;  %v1886_v58 = vld [vmem:[%s3080_s2 + $0x40] ss:$8 sm:$0x3] }
 0x5fc   :  { %v2365_v7 = vpop.eup %2364  ;;  %v1411_v10 = vmul.f32 1.442695, %v1391_v53 }
 0x5fd   :  { %v1384_v47 = vpop.xlane.xlu0 %1383  ;;  %2181 = vmatprep.mubr.f32.mxu1 %v2365_v7 }
 0x5fe   :  { %2370 = vpow2.f32 %v1411_v10  ;;  %v1401_v29 = vsub.f32 %v2921_v17, %v1384_v47 }
 0x600   :  { %v2367_v36 = vpop.eup %2366  ;;  %v1431_v8 = vmul.f32 1.442695, %v1401_v29 }
 0x601   :  { %1441 = vadd.xlane.f32.xlu0 %v2367_v36  ;;  %v1366_v63 = vpop.xlane.xlu0 %1365  ;;  %2167 = vmatmul.mubr.f32.gmra.mrb[34].mxu0 %v2367_v36 }
 0x602   :  { %2372 = vpow2.f32 %v1431_v8  ;;  %v1392_v40 = vsub.f32 %v2925_v6, %v1366_v63  ;;  %v131_v6 = vld [vmem:[%s3080_s2 + $0x58] sm:$0xff] }
 0x604   :  { %v2369_v48 = vpop.eup %2368  ;;  %v1413_v13 = vmul.f32 1.442695, %v1392_v40  ;;  %v3003_v40 = vrot.slane %v1886_v58, %v2554_v4 }
 0x605   :  { %1461 = vadd.xlane.f32.xlu1 %v2369_v48  ;;  %v1386_v56 = vpop.xlane.xlu0 %1385  ;;  %2182 = vmatmul.mubr.f32.gmra.mrb[22].mxu1 %v2369_v48 }
 0x606   :  { %2374 = vpow2.f32 %v1413_v13  ;;  %v1402_v51 = vsub.f32 %v2929_v42, %v1386_v56  ;;  %v133_v42 = vld [vmem:[%s3080_s2 + $0x68] sm:$0xff] }
 0x607   :  { %v2255_v19 = vpack.c.bf16 %v133_v42, %v131_v6 }
 0x608   :  { %v2371_v61 = vpop.eup %2370  ;;  %v1433_v3 = vmul.f32 1.442695, %v1402_v51 }
 0x609   :  { %1443 = vadd.xlane.f32.xlu0 %v2371_v61  ;;  %2169 = vmatprep.mubr.f32.mxu0 %v2371_v61 }
 0x60a   :  { %2376 = vpow2.f32 %v1433_v3  ;;  %2256 = vmatprep.subr.bf16.mxu0 %v2255_v19 }
 0x60b   :  { %2258 = vmatpush1.bf16.msra.mxu0 %v2257_v62 }
 0x60c   :  { %v2373_v17 = vpop.eup %2372 }
 0x60d   :  { %2184 = vmatprep.mubr.f32.mxu1 %v2373_v17 }
 0x610   :  { %v2375_v54 = vpop.eup %2374 }
 0x611   :  { %1445 = vadd.xlane.f32.xlu0 %v2375_v54  ;;  %2170 = vmatmul.mubr.f32.gmra.mrb[36].mxu0 %v2375_v54 }
 0x612   :  { %1852 = vmatprep.mubr.f32.mxu0 %v2437_v49 }
 0x614   :  { %v2377_v0 = vpop.eup %2376 }
 0x615   :  { %1447 = vadd.xlane.f32.xlu0 %v2936_v52  ;;  %1465 = vadd.xlane.f32.xlu1 %v2377_v0 }
 0x616   :  { %2185 = vmatmul.mubr.f32.gmra.mrb[24].mxu1 %v2377_v0 }
 0x619   :  { %1449 = vadd.xlane.f32.xlu0 %v2940_v16 }
 0x61d   :  { %1451 = vadd.xlane.f32.xlu0 %v2944_v28 }
 0x621   :  { %1453 = vadd.xlane.f32.xlu0 %v2948_v38 }
 0x625   :  { %1455 = vadd.xlane.f32.xlu0 %v2357_v11 }
 0x629   :  { %1457 = vadd.xlane.f32.xlu0 %v2361_v60 }
 0x62d   :  { %1459 = vadd.xlane.f32.xlu0 %v2365_v7 }
 0x631   :  { %1463 = vadd.xlane.f32.xlu0 %v2373_v17 }
 0x676   :  { %v1436_v22 = vpop.xlane.xlu0 %1435 }
 0x67e   :  { %v1438_v43 = vpop.xlane.xlu0 %1437 }
 0x686   :  { %v1440_v20 = vpop.xlane.xlu1 %1439 }
 0x68e   :  { %v1442_v52 = vpop.xlane.xlu0 %1441 }
 0x692   :  { %v1462_v24 = vpop.xlane.xlu1 %1461 }
 0x696   :  { %v2976_v12 = vpop.xlane.xlu0 %1443 }
 0x69e   :  { %v2978_v9 = vpop.xlane.xlu0 %1445 }
 0x6a2   :  { %v1448_v32 = vpop.xlane.xlu0 %1447  ;;  %v3006_v51 = vpop.xlane.xlu1 %1465 }
 0x6a3   :  { %2378 = vrcp.f32 %v1448_v32 }
 0x6a6   :  { %v1450_v16 = vpop.xlane.xlu0 %1449 }
 0x6a7   :  { %2380 = vrcp.f32 %v1450_v16 }
 0x6aa   :  { %v1452_v57 = vpop.xlane.xlu0 %1451 }
 0x6ab   :  { %2382 = vrcp.f32 %v1452_v57 }
 0x6ad   :  { %v2379_v33 = vpop.eup %2378 }
 0x6ae   :  { %v1454_v18 = vpop.xlane.xlu0 %1453  ;;  %v1489_v45 = vmul.f32 %v2379_v33, %v1448_v32 }
 0x6af   :  { %2384 = vrcp.f32 %v1454_v18 }
 0x6b0   :  { %v2174_v14 = vpop.f32.mrb[16].mxu1  ;;  %2386 = vrcp.f32 %v1442_v52  ;;  %v1505_v30 = vsub.f32 2.0, %v1489_v45 }
 0x6b1   :  { %v1627_v28 = vpop.f32.mrb[17].mxu1  ;;  %v2381_v31 = vpop.eup %2380  ;;  %2388 = vrcp.f32 %v1440_v20 }
 0x6b2   :  { %v2980_v21 = vpop.xlane.xlu0 %1455  ;;  %2390 = vrcp.f32 %v1436_v22  ;;  %v1490_v35 = vmul.f32 %v2381_v31, %v1450_v16  ;;  %v1521_v41 = vmul.f32 %v2379_v33, %v1505_v30 }
 0x6b3   :  { %2392 = vrcp.f32 %v1438_v43 }
 0x6b4   :  { %2394 = vrcp.f32 %v1462_v24  ;;  %v1506_v39 = vsub.f32 2.0, %v1490_v35  ;;  %v1682_v48 = vmul.f32 %v1627_v28, %v1521_v41 }
 0x6b5   :  { %v2383_v11 = vpop.eup %2382 }
 0x6b6   :  { %v2986_v38 = vpop.xlane.xlu0 %1457  ;;  %v1491_v34 = vmul.f32 %v2383_v11, %v1452_v57  ;;  %v1522_v53 = vmul.f32 %v2381_v31, %v1506_v39  ;;  %v1704_v55 = vadd.f32 %v3003_v40, %v1682_v48 }
 0x6b8   :  { %v2982_v27 = vpop.f32.mrb[18].mxu1  ;;  %v1507_v47 = vsub.f32 2.0, %v1491_v34  ;;  %v1683_v61 = vmul.f32 %v2174_v14, %v1522_v53 }
 0x6b9   :  { %v2984_v25 = vpop.f32.mrb[19].mxu1  ;;  %v2385_v23 = vpop.eup %2384 }
 0x6ba   :  { %v1460_v59 = vpop.xlane.xlu0 %1459  ;;  %v1492_v26 = vmul.f32 %v2385_v23, %v1454_v18  ;;  %v2387_v60 = vpop.eup %2386  ;;  %v1523_v0 = vmul.f32 %v2383_v11, %v1507_v47  ;;  %v1705_v62 = vadd.f32 %v3003_v40, %v1683_v61 }
 0x6bb   :  { %2396 = vrcp.f32 %v1460_v59  ;;  %v2389_v5 = vpop.eup %2388  ;;  %v1486_v10 = vmul.f32 %v2387_v60, %v1442_v52 }
 0x6bc   :  { %v2391_v1 = vpop.eup %2390  ;;  %2398 = vrcp.f32 %v2976_v12  ;;  %v1508_v29 = vsub.f32 2.0, %v1492_v26  ;;  %v1485_v8 = vmul.f32 %v2389_v5, %v1440_v20  ;;  %v1684_v52 = vmul.f32 %v2984_v25, %v1523_v0 }
 0x6bd   :  { %v2393_v7 = vpop.eup %2392  ;;  %2400 = vrcp.f32 %v2986_v38  ;;  %v1483_v13 = vmul.f32 %v2391_v1, %v1436_v22  ;;  %v1502_v3 = vsub.f32 2.0, %v1486_v10  ;;  %v1720_v20 = vmax.f32 %v1704_v55, 0.0 }
 0x6be   :  { %v2395_v36 = vpop.eup %2394  ;;  %2402 = vrcp.f32 %v2978_v9  ;;  %v1484_v56 = vmul.f32 %v2393_v7, %v1438_v43  ;;  %v1524_v54 = vmul.f32 %v2385_v23, %v1508_v29  ;;  %v1501_v6 = vsub.f32 2.0, %v1485_v8  ;;  %v3010_v19 = vpop.xlane.xlu0 %1463 }
 0x6bf   :  { %2404 = vrcp.f32 %v2980_v21  ;;  %v1496_v17 = vmul.f32 %v2395_v36, %v1462_v24  ;;  %v1499_v44 = vsub.f32 2.0, %v1483_v13  ;;  %v1518_v32 = vmul.f32 %v2387_v60, %v1502_v3 }
 0x6c0   :  { %2406 = vrcp.f32 %v3006_v51  ;;  %v1500_v49 = vsub.f32 2.0, %v1484_v56  ;;  %v1685_v43 = vmul.f32 %v2982_v27, %v1524_v54  ;;  %v1517_v14 = vmul.f32 %v2389_v5, %v1501_v6 }
 0x6c1   :  { %v1512_v22 = vsub.f32 2.0, %v1496_v17  ;;  %2408 = vrcp.f32 %v3010_v19  ;;  %v1515_v35 = vmul.f32 %v2391_v1, %v1499_v44  ;;  %v1706_v23 = vadd.f32 %v3003_v40, %v1684_v52 }
 0x6c2   :  { %v1516_v45 = vmul.f32 %v2393_v7, %v1500_v49  ;;  %v1707_v25 = vadd.f32 %v3003_v40, %v1685_v43  ;;  %v1738_v58 = vsel %vm933_vm6, %v1720_v20, -inf }
 0x6c3   :  { %v1528_v39 = vmul.f32 %v2395_v36, %v1512_v22 }
 0x6c4   :  { %v2988_v15 = vpop.f32.mrb[32].mxu0  ;;  %v1723_v48 = vmax.f32 %v1707_v25, 0.0 }
 0x6c5   :  { %v2990_v46 = vpop.f32.mrb[33].mxu0  ;;  %v2397_v63 = vpop.eup %2396  ;;  %v1677_v44 = vmul.f32 %v2988_v15, %v1516_v45 }
 0x6c6   :  { %v1495_v42 = vmul.f32 %v2397_v63, %v1460_v59  ;;  %v3015_v16 = vpop.eup %2398  ;;  %v1721_v59 = vmax.f32 %v1705_v62, 0.0  ;;  %v1752_v62 = vsel %vm933_vm6, %v1723_v48, -inf  ;;  %v1676_v22 = vmul.f32 %v2990_v46, %v1515_v35 }
 0x6c7   :  { %v2401_v28 = vpop.eup %2400  ;;  %v1487_v34 = vmul.f32 %v3015_v16, %v2976_v12  ;;  %v1699_v15 = vadd.f32 %v3003_v40, %v1677_v44 }
 0x6c8   :  { %v2992_v37 = vpop.f32.mrb[20].mxu1  ;;  %v1511_v57 = vsub.f32 2.0, %v1495_v42  ;;  %v2403_v24 = vpop.eup %2402  ;;  %v1494_v26 = vmul.f32 %v2401_v28, %v2986_v38  ;;  %v1740_v47 = vsel %vm933_vm6, %v1721_v59, -inf  ;;  %v1722_v38 = vmax.f32 %v1706_v23, 0.0 }
 0x6c9   :  { %v2994_v50 = vpop.f32.mrb[21].mxu1  ;;  %v2405_v27 = vpop.eup %2404  ;;  %v1488_v1 = vmul.f32 %v2403_v24, %v2978_v9  ;;  %v1503_v17 = vsub.f32 2.0, %v1487_v34  ;;  %v1715_v34 = vmax.f32 %v1699_v15, 0.0  ;;  %v1887_v15 = vld [vmem:[%s3080_s2 + $0x70] ss:$8 sm:$0x3] }
 0x6ca   :  { %v1527_v41 = vmul.f32 %v2397_v63, %v1511_v57  ;;  %v1493_v29 = vmul.f32 %v2405_v27, %v2980_v21  ;;  %v2407_v12 = vpop.eup %2406  ;;  %v1510_v56 = vsub.f32 2.0, %v1494_v26 }
 0x6cb   :  { %v1504_v54 = vsub.f32 2.0, %v1488_v1  ;;  %v2409_v21 = vpop.eup %2408  ;;  %v1498_v42 = vmul.f32 %v2407_v12, %v3006_v51  ;;  %v1519_v25 = vmul.f32 %v3015_v16, %v1503_v17 }
 0x6cc   :  { %v1509_v55 = vsub.f32 2.0, %v1493_v29  ;;  %v1526_v57 = vmul.f32 %v2401_v28, %v1510_v56  ;;  %v1497_v20 = vmul.f32 %v2409_v21, %v3010_v19 }
 0x6cd   :  { %v1514_v46 = vsub.f32 2.0, %v1498_v42 }
 0x6ce   :  { %v1525_v59 = vmul.f32 %v2405_v27, %v1509_v55  ;;  %v1687_v35 = vmul.f32 %v2992_v37, %v1526_v57  ;;  %v1513_v28 = vsub.f32 2.0, %v1497_v20 }
 0x6d0   :  { %v1686_v23 = vmul.f32 %v2994_v50, %v1525_v59  ;;  %v1529_v16 = vmul.f32 %v2409_v21, %v1513_v28  ;;  %v1778_v59 = vrot.slane %v1887_v15, %v2554_v4 }
 0x6d2   :  { %v1708_v37 = vadd.f32 %v3003_v40, %v1686_v23 }
 0x6d4   :  { %v2168_v18 = vpop.f32.mrb[34].mxu0 }
 0x6d5   :  { %v1679_v33 = vmul.f32 %v2168_v18, %v1518_v32  ;;  %v1607_v31 = vpop.f32.mrb[35].mxu0  ;;  %v1751_v32 = vsel %vm933_vm6, %v1722_v38, -inf  ;;  %v1724_v38 = vmax.f32 %v1708_v37, 0.0 }
 0x6d6   :  { %v1678_v11 = vmul.f32 %v1607_v31, %v1517_v14  ;;  %v1698_v31 = vadd.f32 %v3003_v40, %v1676_v22 }
 0x6d7   :  { %v1701_v30 = vadd.f32 %v3003_v40, %v1679_v33  ;;  %v1520_v33 = vmul.f32 %v2403_v24, %v1504_v54  ;;  %v1753_v54 = vsel %vm933_vm6, %v1724_v38, -inf }
 0x6d8   :  { %v1700_v60 = vadd.f32 %v3003_v40, %v1678_v11  ;;  %v2183_v5 = vpop.f32.mrb[22].mxu1  ;;  %v1714_v24 = vmax.f32 %v1698_v31, 0.0  ;;  %v1781_v31 = vsub.s32 1, %v2548_v2 }
 0x6d9   :  { %v1717_v53 = vmax.f32 %v1701_v30, 0.0  ;;  %v1689_v7 = vmul.f32 %v2183_v5, %v1528_v39  ;;  %v1657_v10 = vpop.f32.mrb[23].mxu1  ;;  %v1530_v5 = vmul.f32 %v2407_v12, %v1514_v46 }
 0x6da   :  { %v1716_v36 = vmax.f32 %v1700_v60, 0.0  ;;  %v1688_v8 = vmul.f32 %v1657_v10, %v1527_v41  ;;  %v1709_v60 = vadd.f32 %v3003_v40, %v1687_v35  ;;  %v1730_v10 = vsel %vm933_vm6, %v1714_v24, -inf }
 0x6db   :  { %v1733_v13 = vsel %vm933_vm6, %v1717_v53, -inf  ;;  %v1711_v63 = vadd.f32 %v3003_v40, %v1689_v7  ;;  %v1731_v7 = vsel %vm933_vm6, %v1715_v34, -inf }
 0x6dc   :  { %v1741_v9 = vmax.f32 %v1733_v13, %v1740_v47  ;;  %v1732_v61 = vsel %vm933_vm6, %v1716_v36, -inf  ;;  %v1710_v3 = vadd.f32 %v3003_v40, %v1688_v8  ;;  %v1725_v36 = vmax.f32 %v1709_v60, 0.0 }
 0x6dd   :  { %v1739_v0 = vmax.f32 %v1732_v61, %v1738_v58  ;;  %v1727_v6 = vmax.f32 %v1711_v63, 0.0 }
 0x6de   :  { %v1726_v49 = vmax.f32 %v1710_v3, 0.0  ;;  %v1754_v3 = vsel %vm933_vm6, %v1725_v36, -inf }
 0x6df   :  { %v1743_v43 = vmax.f32 %v1739_v0, %v1741_v9  ;;  %v1757_v52 = vsel %vm933_vm6, %v1727_v6, -inf }
 0x6e0   :  { %v1758_v18 = vmax.f32 %v1752_v62, %v1757_v52  ;;  %v1755_v14 = vsel %vm933_vm6, %v1726_v49, -inf }
 0x6e1   :  { %v1756_v51 = vmax.f32 %v1751_v32, %v1755_v14 }
 0x6e3   :  { %v1763_v45 = vmax.f32 %v1756_v51, %v1758_v18 }
 0x6e4   :  { %v2171_v11 = vpop.f32.mrb[36].mxu0 }
 0x6e5   :  { %v1681_v30 = vmul.f32 %v2171_v11, %v1520_v33  ;;  %v1617_v39 = vpop.f32.mrb[37].mxu0 }
 0x6e6   :  { %v1680_v19 = vmul.f32 %v1617_v39, %v1519_v25 }
 0x6e7   :  { %v1703_v26 = vadd.f32 %v3003_v40, %v1681_v30 }
 0x6e8   :  { %v1702_v27 = vadd.f32 %v3003_v40, %v1680_v19 }
 0x6e9   :  { %v1719_v41 = vmax.f32 %v1703_v26, 0.0  ;;  %v2186_v1 = vpop.f32.mrb[24].mxu1 }
 0x6ea   :  { %v1718_v58 = vmax.f32 %v1702_v27, 0.0  ;;  %v1691_v53 = vmul.f32 %v2186_v1, %v1530_v5  ;;  %v1667_v50 = vpop.f32.mrb[25].mxu1 }
 0x6eb   :  { %v1736_v47 = vsel %vm933_vm6, %v1719_v41, -inf  ;;  %v1690_v29 = vmul.f32 %v1667_v50, %v1529_v16 }
 0x6ec   :  { %v1737_v8 = vmax.f32 %v1731_v7, %v1736_v47  ;;  %v1734_v48 = vsel %vm933_vm6, %v1718_v58, -inf  ;;  %v1713_v12 = vadd.f32 %v3003_v40, %v1691_v53 }
 0x6ed   :  { %v1735_v13 = vmax.f32 %v1730_v10, %v1734_v48  ;;  %v1712_v63 = vadd.f32 %v3003_v40, %v1690_v29 }
 0x6ee   :  { %v1729_v56 = vmax.f32 %v1713_v12, 0.0 }
 0x6ef   :  { %v1742_v9 = vmax.f32 %v1735_v13, %v1737_v8  ;;  %v1728_v61 = vmax.f32 %v1712_v63, 0.0 }
 0x6f0   :  { %v1761_v17 = vsel %vm933_vm6, %v1729_v56, -inf }
 0x6f1   :  { %v1744_v0 = vmax.f32 %v1742_v9, %v1743_v43  ;;  %v1762_v6 = vmax.f32 %v1754_v3, %v1761_v17  ;;  %v1759_v21 = vsel %vm933_vm6, %v1728_v61, -inf }
 0x6f2   :  { %v1760_v42 = vmax.f32 %v1753_v54, %v1759_v21 }
 0x6f3   :  { %v1745_v55 = vrot.slane %v1744_v0, 4 }
 0x6f4   :  { %v1764_v44 = vmax.f32 %v1760_v42, %v1762_v6 }
 0x6f5   :  { %v1746_v49 = vmax.f32 %v1744_v0, %v1745_v55 }
 0x6f6   :  { %v1765_v62 = vmax.f32 %v1763_v45, %v1764_v44  ;;  %v1782_v45 = vrot.slane %v1887_v15, %v1781_v31 }
 0x6f7   :  { %v1747_v22 = vrot.slane %v1746_v49, 2 }
 0x6f8   :  { %v1766_v40 = vrot.slane %v1765_v62, 4 }
 0x6f9   :  { %v1748_v52 = vmax.f32 %v1746_v49, %v1747_v22 }
 0x6fa   :  { %v1767_v32 = vmax.f32 %v1765_v62, %v1766_v40 }
 0x6fb   :  { %v1749_v14 = vrot.slane %v1748_v52, 1 }
 0x6fc   :  { %v1768_v57 = vrot.slane %v1767_v32, 2 }
 0x6fd   :  { %v1750_v51 = vmax.f32 %v1748_v52, %v1749_v14 }
 0x6fe   :  { %v1769_v18 = vmax.f32 %v1767_v32, %v1768_v57 }
 0x700   :  { %v1770_v20 = vrot.slane %v1769_v18, 1 }
 0x702   :  { %v1771_v33 = vmax.f32 %v1769_v18, %v1770_v20 }
 0x704   :  { %v1773_v43 = vsel %vm1772_vm7, %v1750_v51, %v1771_v33 }
 0x705   :  { %1920 = vmatmul.mubr.msk.f32.vlgmr.msra.gmra.mrb[38].mxu0 %vm933_vm6, %v1773_v43 }
 0x7d8   :  { %v1854_v46 = vpop.f32.mrb[38].mxu0 }
 0x7d9   :  { %v1855_v35 = vadd.f32 %v1854_v46, %v1778_v59  ;;  %v1856_v11 = vpop.f32.mrb[39].mxu0 }
 0x7da   :  { %v1857_v25 = vadd.f32 %v1856_v11, %v1782_v45 }
 0x7dc   :  { %v1861_v28 = vcombine.low %v1855_v35, %v1857_v25 }
 0x7de   :  { %1921 = vst.sshfl [vmem:[#allocation2] sm:$0x33 pattern:$0x76325410] %v1861_v28 }
 0x7df   :  { %2421 = shalt.err (!%p2418_p4)
}
 0x7e0   :  { %s2422_s28 = scalar_lea.hbm %s3081_s3, 64 }
 0x7e1   :  { %p2423_p5 = scmp.ne.s32.totalorder %s3081_s3, %s2422_s28  ;;  %p2426_p6 = scmp.lt.u32.totalorder %s2422_s28, %s3081_s3 }
 0x7e3   :  { %p2428_p7 = pnand %p2426_p6, %p2423_p5 }
 0x7e5   :  { %2431 = shalt.err (!%p2428_p7)
}
 0x7e6   :  { %1880 = dma.vmem_to_hbm [thread:$0]  %s1878_s25, 64, %s3081_s3, [#allocation3]  }
 0x7e7   :  { %2432 = dma.done.wait [#allocation3], 64  }
 0x7e8   :  { %2433 = vsyncadd [#allocation3], 4294967232 }
 0x7e9   :  { %1884 = vsyncpa [#allocation3], 1 }

</bundles_post_ra>
